<compile_context>
chip_gen: v7x
topology: tpu7x:2x2x1
jax: 0.10.0
libtpu: 0.0.40
codegen_flags: <defaults>
</compile_context>

<pallas_src>
import math
import numpy as np
import jax
import jax.numpy as jnp
from jax import lax
from jax.experimental import pallas as pl
from jax.experimental.pallas import tpu as pltpu

# ------------------------------- configuration -------------------------------
D_MODEL   = 64
NUM_HEADS = 4
D_FF      = 128
MIN_DIM   = 8          # MultiHeadAttention default
B, T      = 2, 8
LN_EPS    = 1e-5       # nn.LayerNorm default
_SQRT_HALF = 0.7071067811865476

# ----------------- consts-slab row layout (width = 2*D_MODEL = 128) ----------
ROW_BQK  = (0, 2)      # per attn block: [q bias (pre-scaled) | k bias]
ROW_BVO  = (1, 3)      # per attn block: [v bias | out-proj bias]
ROW_BF1  = 4           # fc1 bias (D_FF wide)
ROW_BF2  = 5           # [fc2 bias | 0]
ROW_LN1  = 6           # [gamma | beta] of norm1
ROW_LN2  = 7           # norm2
ROW_LNFF = 8           # FeedForward's internal LayerNorm
ROW_LN3  = 9           # norm3
ROW_MASK = 10          # 0/1 per-head column masks, 2 heads per row
MASK_ROWS_PER_BLOCK = (NUM_HEADS + 1) // 2
CONST_ROWS = 16


# ----------------------------- in-kernel helpers -----------------------------
def _erf(x):
    # TODO(synk): lax.erf has no guaranteed Mosaic lowering; use the
    # Abramowitz & Stegun 7.1.26 rational approximation (max abs err ~1.5e-7,
    # i.e. ~float32 eps) so exact-GELU (nn.GELU default) semantics are kept.
    a1, a2, a3, a4, a5 = 0.254829592, -0.284496736, 1.421413741, -1.453152027, 1.061405429
    p = 0.3275911
    sign = jnp.where(x >= 0.0, 1.0, -1.0)
    ax = jnp.abs(x)
    t = 1.0 / (1.0 + p * ax)          # exact divide (kernel is launch/DMA-bound)
    poly = ((((a5 * t + a4) * t + a3) * t + a2) * t + a1) * t
    return sign * (1.0 - poly * jnp.exp(-ax * ax))


def _gelu_exact(x):
    return 0.5 * x * (1.0 + _erf(x * _SQRT_HALF))


# --------------------------------- the kernel --------------------------------
def make_decoder_kernel(batch, seq):
    """Single-invocation DecoderLayer kernel for a (batch*seq, D_MODEL) slab."""

    def decoder_kernel(x_ref, wqkv_ref, wo_ref, wf1_ref, wf2_ref, c_ref, o_ref):
        x = x_ref[...]                                       # (batch*seq, D)

        def layer_norm(v, row):
            g = c_ref[row:row + 1, 0:D_MODEL]
            b = c_ref[row:row + 1, D_MODEL:2 * D_MODEL]
            mu = jnp.mean(v, axis=-1, keepdims=True)
            vc = v - mu
            var = jnp.mean(vc * vc, axis=-1, keepdims=True)
            return vc * lax.rsqrt(var + LN_EPS) * g + b      # rsqrt -> EUP

        def attention(v_in, blk):
            # Fused QKV matmul on the whole (batch*seq, D) slab.
            w = wqkv_ref[blk * D_MODEL:(blk + 1) * D_MODEL, :]          # (D, 3D)
            qkv = jnp.dot(v_in, w, preferred_element_type=jnp.float32)  # (BT, 3D)
            rq, rv = ROW_BQK[blk], ROW_BVO[blk]
            q = qkv[:, 0:D_MODEL] + c_ref[rq:rq + 1, 0:D_MODEL]         # q pre-scaled
            k = qkv[:, D_MODEL:2 * D_MODEL] + c_ref[rq:rq + 1, D_MODEL:2 * D_MODEL]
            v = qkv[:, 2 * D_MODEL:3 * D_MODEL] + c_ref[rv:rv + 1, 0:D_MODEL]

            ctx_rows = []
            for bi in range(batch):                 # per-sequence softmax, unrolled
                r0 = bi * seq
                qb = q[r0:r0 + seq, :]
                kb = k[r0:r0 + seq, :]
                vb = v[r0:r0 + seq, :]
                ctx_b = jnp.zeros((seq, D_MODEL), jnp.float32)
                for h in range(NUM_HEADS):          # static unroll; disjoint masks
                    mrow = ROW_MASK + blk * MASK_ROWS_PER_BLOCK + h // 2
                    moff = (h % 2) * D_MODEL
                    m = c_ref[mrow:mrow + 1, moff:moff + D_MODEL]       # (1, D) 0/1
                    # masked contraction == per-head slice (masked terms add 0.0)
                    s = lax.dot_general(qb, kb * m, (((1,), (1,)), ((), ())),
                                        preferred_element_type=jnp.float32)  # (T,T)
                    smax = jnp.max(s, axis=-1, keepdims=True)
                    e = jnp.exp(s - smax)
                    a = e / jnp.sum(e, axis=-1, keepdims=True)          # exact softmax
                    ctx_b = ctx_b + jnp.dot(a, vb,
                                            preferred_element_type=jnp.float32) * m
                ctx_rows.append(ctx_b)
            ctx = jnp.concatenate(ctx_rows, axis=0) if batch > 1 else ctx_rows[0]
            wo = wo_ref[blk * D_MODEL:(blk + 1) * D_MODEL, :]           # (D, D)
            bo = c_ref[rv:rv + 1, D_MODEL:2 * D_MODEL]
            return jnp.dot(ctx, wo, preferred_element_type=jnp.float32) + bo

        def feed_forward(v_in):
            h = jnp.dot(v_in, wf1_ref[...], preferred_element_type=jnp.float32) \
                + c_ref[ROW_BF1:ROW_BF1 + 1, 0:D_FF]
            h = _gelu_exact(h)                                   # dropout = identity
            y = jnp.dot(h, wf2_ref[...], preferred_element_type=jnp.float32) \
                + c_ref[ROW_BF2:ROW_BF2 + 1, 0:D_MODEL]
            return layer_norm(y + v_in, ROW_LNFF)                # FF's own LayerNorm

        # --- self attention -> norm1 ---
        out = layer_norm(x + attention(x, 0), ROW_LN1)
        # --- "cross" attention (reference MHA uses `query` only) -> norm2 ---
        out = layer_norm(out + attention(out, 1), ROW_LN2)
        # --- feed forward -> norm3 ---
        out = layer_norm(out + feed_forward(out), ROW_LN3)
        o_ref[...] = out

    return decoder_kernel


# ------------------------- host-side packing / glue ---------------------------
def _compute_integer_dims(hdf):
    """Replicates MultiHeadAttention._compute_integer_dims."""
    hdi = np.floor(hdf).astype(np.int64)
    diff = int(D_MODEL - hdi.sum())
    residuals = hdf - np.floor(hdf)
    if diff > 0:
        idx = np.argsort(-residuals, kind='stable')[:diff]
        hdi[idx] += 1
    elif diff < 0:
        idx = np.argsort(residuals, kind='stable')[:(-diff)]
        hdi[idx] -= 1
    return hdi


def _head_dims(logits_np):
    z = logits_np - logits_np.max()
    ratios = np.exp(z) / np.exp(z).sum()
    hdf = MIN_DIM + ratios * (D_MODEL - MIN_DIM * NUM_HEADS)
    return tuple(int(d) for d in _compute_integer_dims(hdf))


def _pack_attention_block(Wqkv, bqkv, Wo, head_dims):
    """Tight (D, 3D) qkv slab with 1/sqrt(d_h) folded into q, plus 0/1 masks."""
    WqkvT = np.asarray(Wqkv, np.float32).T.copy()      # (D, 3D); cols 0:D are q
    b = np.asarray(bqkv, np.float32).copy()
    WoT = np.asarray(Wo, np.float32).T.copy()          # (D, D)
    mask = np.zeros((NUM_HEADS, D_MODEL), np.float32)
    s = 0
    for i, d in enumerate(head_dims):
        sc = np.float32(1.0 / math.sqrt(d))
        WqkvT[:, s:s + d] *= sc                        # q columns of head i
        b[s:s + d] *= sc
        mask[i, s:s + d] = 1.0
        s += d
    bq, bk, bv = b[0:D_MODEL], b[D_MODEL:2 * D_MODEL], b[2 * D_MODEL:3 * D_MODEL]
    return WqkvT, bq, bk, bv, WoT, mask


def build_kernel_inputs(params, head_dims_self, head_dims_cross):
    (Wqkv_s, bqkv_s, Wo_s, bo_s,
     Wqkv_c, bqkv_c, Wo_c, bo_c,
     W1, b1f, W2, b2f,
     g1, be1, g2, be2, gff, beff, g3, be3) = params

    wq_s, bq_s, bk_s, bv_s, woT_s, mask_s = _pack_attention_block(
        Wqkv_s, bqkv_s, Wo_s, head_dims_self)
    wq_c, bq_c, bk_c, bv_c, woT_c, mask_c = _pack_attention_block(
        Wqkv_c, bqkv_c, Wo_c, head_dims_cross)

    wqkv = np.concatenate([wq_s, wq_c], axis=0)                 # (2D, 3D)
    wo   = np.concatenate([woT_s, woT_c], axis=0)               # (2D, D)
    wf1  = np.asarray(W1, np.float32).T.copy()                  # (D, D_FF)
    wf2  = np.asarray(W2, np.float32).T.copy()                  # (D_FF, D)

    consts = np.zeros((CONST_ROWS, 2 * D_MODEL), np.float32)
    consts[ROW_BQK[0], 0:D_MODEL] = bq_s
    consts[ROW_BQK[0], D_MODEL:]  = bk_s
    consts[ROW_BVO[0], 0:D_MODEL] = bv_s
    consts[ROW_BVO[0], D_MODEL:]  = np.asarray(bo_s, np.float32).reshape(-1)
    consts[ROW_BQK[1], 0:D_MODEL] = bq_c
    consts[ROW_BQK[1], D_MODEL:]  = bk_c
    consts[ROW_BVO[1], 0:D_MODEL] = bv_c
    consts[ROW_BVO[1], D_MODEL:]  = np.asarray(bo_c, np.float32).reshape(-1)
    consts[ROW_BF1, 0:D_FF]       = np.asarray(b1f, np.float32).reshape(-1)
    consts[ROW_BF2, 0:D_MODEL]    = np.asarray(b2f, np.float32).reshape(-1)
    for row, (g, be) in ((ROW_LN1, (g1, be1)), (ROW_LN2, (g2, be2)),
                         (ROW_LNFF, (gff, beff)), (ROW_LN3, (g3, be3))):
        consts[row, 0:D_MODEL] = np.asarray(g, np.float32).reshape(-1)
        consts[row, D_MODEL:]  = np.asarray(be, np.float32).reshape(-1)
    for blk, mask in enumerate((mask_s, mask_c)):
        for h in range(NUM_HEADS):
            r = ROW_MASK + blk * MASK_ROWS_PER_BLOCK + h // 2
            c0 = (h % 2) * D_MODEL
            consts[r, c0:c0 + D_MODEL] = mask[h]

    return (jnp.asarray(wqkv), jnp.asarray(wo), jnp.asarray(wf1),
            jnp.asarray(wf2), jnp.asarray(consts))


def _aux_loss(logits, head_dims_int):
    ratios = jax.nn.softmax(logits)
    hdf = MIN_DIM + ratios * (D_MODEL - MIN_DIM * NUM_HEADS)
    float_loss = (jnp.sum(hdf) - D_MODEL) ** 2 + jnp.mean(jax.nn.relu(MIN_DIM - hdf))
    int_loss = jnp.mean((hdf - jnp.asarray(head_dims_int, jnp.float32)) ** 2)
    return float_loss + 0.5 * int_loss


def decoder_layer_forward(x, enc_output, kernel_inputs,
                          head_dims_self, head_dims_cross,
                          logits_self, logits_cross):
    # enc_output / masks are accepted for API parity but (matching the reference
    # PyTorch module) never used by the computation.
    del enc_output
    Bq, Tq, Dq = x.shape
    x2d = x.reshape(Bq * Tq, Dq)
    out2d = pl.pallas_call(
        make_decoder_kernel(Bq, Tq),
        out_shape=jax.ShapeDtypeStruct((Bq * Tq, Dq), jnp.float32),
        in_specs=[pl.BlockSpec(memory_space=pltpu.MemorySpace.VMEM)] * 6,
        out_specs=pl.BlockSpec(memory_space=pltpu.MemorySpace.VMEM),
    )(x2d, *kernel_inputs)
    out = out2d.reshape(Bq, Tq, Dq)
    aux = _aux_loss(logits_self, head_dims_self) + _aux_loss(logits_cross, head_dims_cross)
    return out, aux


# -------------------------- pure-JAX reference check --------------------------
def _reference_forward(x, params, head_dims_self, head_dims_cross):
    (Wqkv_s, bqkv_s, Wo_s, bo_s,
     Wqkv_c, bqkv_c, Wo_c, bo_c,
     W1, b1f, W2, b2f,
     g1, be1, g2, be2, gff, beff, g3, be3) = params
    hp = lax.Precision.HIGHEST

    def layer_norm(v, g, b):
        mu = jnp.mean(v, -1, keepdims=True)
        var = jnp.mean((v - mu) ** 2, -1, keepdims=True)
        return (v - mu) / jnp.sqrt(var + LN_EPS) * g + b

    def mha(q_in, Wqkv, bqkv, Wo, bo, head_dims):
        qkv = jnp.einsum('btd,ed->bte', q_in, Wqkv, precision=hp) + bqkv
        q_all, k_all, v_all = jnp.split(qkv, 3, axis=-1)
        outs, s0 = [], 0
        for d in head_dims:
            q = q_all[:, :, s0:s0 + d]; k = k_all[:, :, s0:s0 + d]; v = v_all[:, :, s0:s0 + d]
            s0 += d
            sc = jnp.einsum('btd,bsd->bts', q, k, precision=hp) / (d ** 0.5)
            a = jax.nn.softmax(sc, axis=-1)
            outs.append(jnp.einsum('bts,bsd->btd', a, v, precision=hp))
        ctx = jnp.concatenate(outs, axis=-1)
        return jnp.einsum('btd,ed->bte', ctx, Wo, precision=hp) + bo

    x1 = layer_norm(x + mha(x, Wqkv_s, bqkv_s, Wo_s, bo_s, head_dims_self), g1, be1)
    x2 = layer_norm(x1 + mha(x1, Wqkv_c, bqkv_c, Wo_c, bo_c, head_dims_cross), g2, be2)
    h = jnp.einsum('btd,fd->btf', x2, W1, precision=hp) + b1f
    h = jax.nn.gelu(h, approximate=False)
    y = jnp.einsum('btf,df->btd', h, W2, precision=hp) + b2f
    f = layer_norm(y + x2, gff, beff)
    return layer_norm(x2 + f, g3, be3)


# ------------------------------------ main ------------------------------------
if __name__ == "__main__":
    root = jax.random.PRNGKey(0)
    ks = jax.random.split(root, 24)

    def uniform(k, shape, fan_in):
        bound = 1.0 / math.sqrt(fan_in)
        return jax.random.uniform(k, shape, jnp.float32, -bound, bound)

    # --- MultiHeadAttention parameters (self and cross) ---
    logits_self  = jax.random.normal(ks[0], (NUM_HEADS,), jnp.float32)
    logits_cross = jax.random.normal(ks[1], (NUM_HEADS,), jnp.float32)
    Wqkv_self  = uniform(ks[2], (3 * D_MODEL, D_MODEL), D_MODEL)
    bqkv_self  = uniform(ks[3], (3 * D_MODEL,), D_MODEL)
    Wo_self    = uniform(ks[4], (D_MODEL, D_MODEL), D_MODEL)
    bo_self    = uniform(ks[5], (D_MODEL,), D_MODEL).reshape(1, D_MODEL)
    Wqkv_cross = uniform(ks[6], (3 * D_MODEL, D_MODEL), D_MODEL)
    bqkv_cross = uniform(ks[7], (3 * D_MODEL,), D_MODEL)
    Wo_cross   = uniform(ks[8], (D_MODEL, D_MODEL), D_MODEL)
    bo_cross   = uniform(ks[9], (D_MODEL,), D_MODEL).reshape(1, D_MODEL)

    # --- FeedForward parameters (PyTorch (out, in) layout) ---
    W1  = uniform(ks[10], (D_FF, D_MODEL), D_MODEL)
    b1f = uniform(ks[11], (D_FF,), D_MODEL).reshape(1, D_FF)
    W2  = uniform(ks[12], (D_MODEL, D_FF), D_FF)
    b2f = uniform(ks[13], (D_MODEL,), D_FF).reshape(1, D_MODEL)

    # --- LayerNorm parameters (PyTorch default init: ones / zeros) ---
    ones  = jnp.ones((1, D_MODEL), jnp.float32)
    zeros = jnp.zeros((1, D_MODEL), jnp.float32)

    params = (Wqkv_self, bqkv_self, Wo_self, bo_self,
              Wqkv_cross, bqkv_cross, Wo_cross, bo_cross,
              W1, b1f, W2, b2f,
              ones, zeros, ones, zeros, ones, zeros, ones, zeros)

    # --- static, parameter-only head-dim assignment ---
    head_dims_self  = _head_dims(np.asarray(logits_self))
    head_dims_cross = _head_dims(np.asarray(logits_cross))

    kernel_inputs = build_kernel_inputs(params, head_dims_self, head_dims_cross)

    # --- example inputs ---
    x   = 0.5 * jax.random.normal(ks[20], (B, T, D_MODEL), jnp.float32)
    enc = 0.5 * jax.random.normal(ks[21], (B, T, D_MODEL), jnp.float32)  # unused by math

    out, aux_loss = decoder_layer_forward(
        x, enc, kernel_inputs, head_dims_self, head_dims_cross,
        logits_self, logits_cross)
    jax.block_until_ready((out, aux_loss))
    assert out.shape == (B, T, D_MODEL)

    ref = _reference_forward(x, params, head_dims_self, head_dims_cross)
    np.testing.assert_allclose(np.asarray(out), np.asarray(ref), rtol=5e-4, atol=5e-4)
    print("KERNEL_OK")
</pallas_src>

<mosaic_0001>
module attributes {stable_mosaic.version = 11 : i64} {
  func.func @decoder_kernel(%arg0: memref<16x64xf32, #tpu.memory_space<vmem>>, %arg1: memref<128x192xf32, #tpu.memory_space<vmem>>, %arg2: memref<128x64xf32, #tpu.memory_space<vmem>>, %arg3: memref<64x128xf32, #tpu.memory_space<vmem>>, %arg4: memref<128x64xf32, #tpu.memory_space<vmem>>, %arg5: memref<16x128xf32, #tpu.memory_space<vmem>>, %arg6: memref<16x64xf32, #tpu.memory_space<vmem>>) attributes {dimension_semantics = [], scalar_prefetch = 0 : i64, scratch_operands = 0 : i64, tpu.core_type = #tpu.core_type<tc>} {
    %c0 = arith.constant 0 : index
    %c0_0 = arith.constant 0 : index
    %0 = vector.load %arg0[%c0, %c0_0] : memref<16x64xf32, #tpu.memory_space<vmem>>, vector<16x64xf32>
    %c0_1 = arith.constant 0 : index
    %c0_2 = arith.constant 0 : index
    %1 = vector.load %arg1[%c0_1, %c0_2] : memref<128x192xf32, #tpu.memory_space<vmem>>, vector<64x192xf32>
    %cst = arith.constant dense<0.000000e+00> : vector<16x192xf32>
    %2 = tpu.matmul %0, %1, %cst {dimension_numbers = #tpu.dot_dimension_numbers<[1], [0], [0], [1], [0, 0, 1, 1], [], []>} : vector<16x64xf32>, vector<64x192xf32>, vector<16x192xf32> -> vector<16x192xf32>
    %3 = vector.extract_strided_slice %2 {offsets = [0, 0], sizes = [16, 64], strides = [1, 1]} : vector<16x192xf32> to vector<16x64xf32>
    %c0_3 = arith.constant 0 : index
    %c0_4 = arith.constant 0 : index
    %4 = vector.load %arg5[%c0_3, %c0_4] : memref<16x128xf32, #tpu.memory_space<vmem>>, vector<1x64xf32>
    %5 = vector.broadcast %4 : vector<1x64xf32> to vector<16x64xf32>
    %6 = arith.addf %3, %5 : vector<16x64xf32>
    %7 = vector.extract_strided_slice %2 {offsets = [0, 64], sizes = [16, 64], strides = [1, 1]} : vector<16x192xf32> to vector<16x64xf32>
    %c0_5 = arith.constant 0 : index
    %c64 = arith.constant 64 : index
    %8 = vector.load %arg5[%c0_5, %c64] : memref<16x128xf32, #tpu.memory_space<vmem>>, vector<1x64xf32>
    %9 = vector.broadcast %8 : vector<1x64xf32> to vector<16x64xf32>
    %10 = arith.addf %7, %9 : vector<16x64xf32>
    %11 = vector.extract_strided_slice %2 {offsets = [0, 128], sizes = [16, 64], strides = [1, 1]} : vector<16x192xf32> to vector<16x64xf32>
    %c1 = arith.constant 1 : index
    %c0_6 = arith.constant 0 : index
    %12 = vector.load %arg5[%c1, %c0_6] : memref<16x128xf32, #tpu.memory_space<vmem>>, vector<1x64xf32>
    %13 = vector.broadcast %12 : vector<1x64xf32> to vector<16x64xf32>
    %14 = arith.addf %11, %13 : vector<16x64xf32>
    %15 = vector.extract_strided_slice %6 {offsets = [0, 0], sizes = [8, 64], strides = [1, 1]} : vector<16x64xf32> to vector<8x64xf32>
    %16 = vector.extract_strided_slice %10 {offsets = [0, 0], sizes = [8, 64], strides = [1, 1]} : vector<16x64xf32> to vector<8x64xf32>
    %17 = vector.extract_strided_slice %14 {offsets = [0, 0], sizes = [8, 64], strides = [1, 1]} : vector<16x64xf32> to vector<8x64xf32>
    %cst_7 = arith.constant 0.000000e+00 : f32
    %18 = vector.broadcast %cst_7 : f32 to vector<8x64xf32>
    %c10 = arith.constant 10 : index
    %c0_8 = arith.constant 0 : index
    %19 = vector.load %arg5[%c10, %c0_8] : memref<16x128xf32, #tpu.memory_space<vmem>>, vector<1x64xf32>
    %20 = vector.broadcast %19 : vector<1x64xf32> to vector<8x64xf32>
    %21 = arith.mulf %16, %20 : vector<8x64xf32>
    %cst_9 = arith.constant dense<0.000000e+00> : vector<8x8xf32>
    %22 = tpu.matmul %15, %21, %cst_9 {dimension_numbers = #tpu.dot_dimension_numbers<[1], [1], [0], [0], [0, 0, 1, 0], [], []>} : vector<8x64xf32>, vector<8x64xf32>, vector<8x8xf32> -> vector<8x8xf32>
    %cst_10 = arith.constant dense<0xFF800000> : vector<8xf32>
    %23 = vector.multi_reduction <maximumf>, %22, %cst_10 [1] : vector<8x8xf32> to vector<8xf32>
    %24 = vector.shape_cast %23 : vector<8xf32> to vector<8x1xf32>
    %25 = vector.broadcast %24 : vector<8x1xf32> to vector<8x8xf32>
    %26 = arith.subf %22, %25 : vector<8x8xf32>
    %27 = math.exp %26 : vector<8x8xf32>
    %cst_11 = arith.constant dense<0.000000e+00> : vector<8xf32>
    %28 = vector.multi_reduction <add>, %27, %cst_11 [1] : vector<8x8xf32> to vector<8xf32>
    %29 = vector.shape_cast %28 : vector<8xf32> to vector<8x1xf32>
    %30 = vector.broadcast %29 : vector<8x1xf32> to vector<8x8xf32>
    %31 = arith.divf %27, %30 : vector<8x8xf32>
    %cst_12 = arith.constant dense<0.000000e+00> : vector<8x64xf32>
    %32 = tpu.matmul %31, %17, %cst_12 {dimension_numbers = #tpu.dot_dimension_numbers<[1], [0], [0], [1], [0, 0, 1, 1], [], []>} : vector<8x8xf32>, vector<8x64xf32>, vector<8x64xf32> -> vector<8x64xf32>
    %33 = vector.broadcast %19 : vector<1x64xf32> to vector<8x64xf32>
    %34 = arith.mulf %32, %33 : vector<8x64xf32>
    %35 = arith.addf %18, %34 : vector<8x64xf32>
    %c10_13 = arith.constant 10 : index
    %c64_14 = arith.constant 64 : index
    %36 = vector.load %arg5[%c10_13, %c64_14] : memref<16x128xf32, #tpu.memory_space<vmem>>, vector<1x64xf32>
    %37 = vector.broadcast %36 : vector<1x64xf32> to vector<8x64xf32>
    %38 = arith.mulf %16, %37 : vector<8x64xf32>
    %cst_15 = arith.constant dense<0.000000e+00> : vector<8x8xf32>
    %39 = tpu.matmul %15, %38, %cst_15 {dimension_numbers = #tpu.dot_dimension_numbers<[1], [1], [0], [0], [0, 0, 1, 0], [], []>} : vector<8x64xf32>, vector<8x64xf32>, vector<8x8xf32> -> vector<8x8xf32>
    %cst_16 = arith.constant dense<0xFF800000> : vector<8xf32>
    %40 = vector.multi_reduction <maximumf>, %39, %cst_16 [1] : vector<8x8xf32> to vector<8xf32>
    %41 = vector.shape_cast %40 : vector<8xf32> to vector<8x1xf32>
    %42 = vector.broadcast %41 : vector<8x1xf32> to vector<8x8xf32>
    %43 = arith.subf %39, %42 : vector<8x8xf32>
    %44 = math.exp %43 : vector<8x8xf32>
    %cst_17 = arith.constant dense<0.000000e+00> : vector<8xf32>
    %45 = vector.multi_reduction <add>, %44, %cst_17 [1] : vector<8x8xf32> to vector<8xf32>
    %46 = vector.shape_cast %45 : vector<8xf32> to vector<8x1xf32>
    %47 = vector.broadcast %46 : vector<8x1xf32> to vector<8x8xf32>
    %48 = arith.divf %44, %47 : vector<8x8xf32>
    %cst_18 = arith.constant dense<0.000000e+00> : vector<8x64xf32>
    %49 = tpu.matmul %48, %17, %cst_18 {dimension_numbers = #tpu.dot_dimension_numbers<[1], [0], [0], [1], [0, 0, 1, 1], [], []>} : vector<8x8xf32>, vector<8x64xf32>, vector<8x64xf32> -> vector<8x64xf32>
    %50 = vector.broadcast %36 : vector<1x64xf32> to vector<8x64xf32>
    %51 = arith.mulf %49, %50 : vector<8x64xf32>
    %52 = arith.addf %35, %51 : vector<8x64xf32>
    %c11 = arith.constant 11 : index
    %c0_19 = arith.constant 0 : index
    %53 = vector.load %arg5[%c11, %c0_19] : memref<16x128xf32, #tpu.memory_space<vmem>>, vector<1x64xf32>
    %54 = vector.broadcast %53 : vector<1x64xf32> to vector<8x64xf32>
    %55 = arith.mulf %16, %54 : vector<8x64xf32>
    %cst_20 = arith.constant dense<0.000000e+00> : vector<8x8xf32>
    %56 = tpu.matmul %15, %55, %cst_20 {dimension_numbers = #tpu.dot_dimension_numbers<[1], [1], [0], [0], [0, 0, 1, 0], [], []>} : vector<8x64xf32>, vector<8x64xf32>, vector<8x8xf32> -> vector<8x8xf32>
    %cst_21 = arith.constant dense<0xFF800000> : vector<8xf32>
    %57 = vector.multi_reduction <maximumf>, %56, %cst_21 [1] : vector<8x8xf32> to vector<8xf32>
    %58 = vector.shape_cast %57 : vector<8xf32> to vector<8x1xf32>
    %59 = vector.broadcast %58 : vector<8x1xf32> to vector<8x8xf32>
    %60 = arith.subf %56, %59 : vector<8x8xf32>
    %61 = math.exp %60 : vector<8x8xf32>
    %cst_22 = arith.constant dense<0.000000e+00> : vector<8xf32>
    %62 = vector.multi_reduction <add>, %61, %cst_22 [1] : vector<8x8xf32> to vector<8xf32>
    %63 = vector.shape_cast %62 : vector<8xf32> to vector<8x1xf32>
    %64 = vector.broadcast %63 : vector<8x1xf32> to vector<8x8xf32>
    %65 = arith.divf %61, %64 : vector<8x8xf32>
    %cst_23 = arith.constant dense<0.000000e+00> : vector<8x64xf32>
    %66 = tpu.matmul %65, %17, %cst_23 {dimension_numbers = #tpu.dot_dimension_numbers<[1], [0], [0], [1], [0, 0, 1, 1], [], []>} : vector<8x8xf32>, vector<8x64xf32>, vector<8x64xf32> -> vector<8x64xf32>
    %67 = vector.broadcast %53 : vector<1x64xf32> to vector<8x64xf32>
    %68 = arith.mulf %66, %67 : vector<8x64xf32>
    %69 = arith.addf %52, %68 : vector<8x64xf32>
    %c11_24 = arith.constant 11 : index
    %c64_25 = arith.constant 64 : index
    %70 = vector.load %arg5[%c11_24, %c64_25] : memref<16x128xf32, #tpu.memory_space<vmem>>, vector<1x64xf32>
    %71 = vector.broadcast %70 : vector<1x64xf32> to vector<8x64xf32>
    %72 = arith.mulf %16, %71 : vector<8x64xf32>
    %cst_26 = arith.constant dense<0.000000e+00> : vector<8x8xf32>
    %73 = tpu.matmul %15, %72, %cst_26 {dimension_numbers = #tpu.dot_dimension_numbers<[1], [1], [0], [0], [0, 0, 1, 0], [], []>} : vector<8x64xf32>, vector<8x64xf32>, vector<8x8xf32> -> vector<8x8xf32>
    %cst_27 = arith.constant dense<0xFF800000> : vector<8xf32>
    %74 = vector.multi_reduction <maximumf>, %73, %cst_27 [1] : vector<8x8xf32> to vector<8xf32>
    %75 = vector.shape_cast %74 : vector<8xf32> to vector<8x1xf32>
    %76 = vector.broadcast %75 : vector<8x1xf32> to vector<8x8xf32>
    %77 = arith.subf %73, %76 : vector<8x8xf32>
    %78 = math.exp %77 : vector<8x8xf32>
    %cst_28 = arith.constant dense<0.000000e+00> : vector<8xf32>
    %79 = vector.multi_reduction <add>, %78, %cst_28 [1] : vector<8x8xf32> to vector<8xf32>
    %80 = vector.shape_cast %79 : vector<8xf32> to vector<8x1xf32>
    %81 = vector.broadcast %80 : vector<8x1xf32> to vector<8x8xf32>
    %82 = arith.divf %78, %81 : vector<8x8xf32>
    %cst_29 = arith.constant dense<0.000000e+00> : vector<8x64xf32>
    %83 = tpu.matmul %82, %17, %cst_29 {dimension_numbers = #tpu.dot_dimension_numbers<[1], [0], [0], [1], [0, 0, 1, 1], [], []>} : vector<8x8xf32>, vector<8x64xf32>, vector<8x64xf32> -> vector<8x64xf32>
    %84 = vector.broadcast %70 : vector<1x64xf32> to vector<8x64xf32>
    %85 = arith.mulf %83, %84 : vector<8x64xf32>
    %86 = arith.addf %69, %85 : vector<8x64xf32>
    %87 = vector.extract_strided_slice %6 {offsets = [8, 0], sizes = [8, 64], strides = [1, 1]} : vector<16x64xf32> to vector<8x64xf32>
    %88 = vector.extract_strided_slice %10 {offsets = [8, 0], sizes = [8, 64], strides = [1, 1]} : vector<16x64xf32> to vector<8x64xf32>
    %89 = vector.extract_strided_slice %14 {offsets = [8, 0], sizes = [8, 64], strides = [1, 1]} : vector<16x64xf32> to vector<8x64xf32>
    %cst_30 = arith.constant 0.000000e+00 : f32
    %90 = vector.broadcast %cst_30 : f32 to vector<8x64xf32>
    %c10_31 = arith.constant 10 : index
    %c0_32 = arith.constant 0 : index
    %91 = vector.load %arg5[%c10_31, %c0_32] : memref<16x128xf32, #tpu.memory_space<vmem>>, vector<1x64xf32>
    %92 = vector.broadcast %91 : vector<1x64xf32> to vector<8x64xf32>
    %93 = arith.mulf %88, %92 : vector<8x64xf32>
    %cst_33 = arith.constant dense<0.000000e+00> : vector<8x8xf32>
    %94 = tpu.matmul %87, %93, %cst_33 {dimension_numbers = #tpu.dot_dimension_numbers<[1], [1], [0], [0], [0, 0, 1, 0], [], []>} : vector<8x64xf32>, vector<8x64xf32>, vector<8x8xf32> -> vector<8x8xf32>
    %cst_34 = arith.constant dense<0xFF800000> : vector<8xf32>
    %95 = vector.multi_reduction <maximumf>, %94, %cst_34 [1] : vector<8x8xf32> to vector<8xf32>
    %96 = vector.shape_cast %95 : vector<8xf32> to vector<8x1xf32>
    %97 = vector.broadcast %96 : vector<8x1xf32> to vector<8x8xf32>
    %98 = arith.subf %94, %97 : vector<8x8xf32>
    %99 = math.exp %98 : vector<8x8xf32>
    %cst_35 = arith.constant dense<0.000000e+00> : vector<8xf32>
    %100 = vector.multi_reduction <add>, %99, %cst_35 [1] : vector<8x8xf32> to vector<8xf32>
    %101 = vector.shape_cast %100 : vector<8xf32> to vector<8x1xf32>
    %102 = vector.broadcast %101 : vector<8x1xf32> to vector<8x8xf32>
    %103 = arith.divf %99, %102 : vector<8x8xf32>
    %cst_36 = arith.constant dense<0.000000e+00> : vector<8x64xf32>
    %104 = tpu.matmul %103, %89, %cst_36 {dimension_numbers = #tpu.dot_dimension_numbers<[1], [0], [0], [1], [0, 0, 1, 1], [], []>} : vector<8x8xf32>, vector<8x64xf32>, vector<8x64xf32> -> vector<8x64xf32>
    %105 = vector.broadcast %91 : vector<1x64xf32> to vector<8x64xf32>
    %106 = arith.mulf %104, %105 : vector<8x64xf32>
    %107 = arith.addf %90, %106 : vector<8x64xf32>
    %c10_37 = arith.constant 10 : index
    %c64_38 = arith.constant 64 : index
    %108 = vector.load %arg5[%c10_37, %c64_38] : memref<16x128xf32, #tpu.memory_space<vmem>>, vector<1x64xf32>
    %109 = vector.broadcast %108 : vector<1x64xf32> to vector<8x64xf32>
    %110 = arith.mulf %88, %109 : vector<8x64xf32>
    %cst_39 = arith.constant dense<0.000000e+00> : vector<8x8xf32>
    %111 = tpu.matmul %87, %110, %cst_39 {dimension_numbers = #tpu.dot_dimension_numbers<[1], [1], [0], [0], [0, 0, 1, 0], [], []>} : vector<8x64xf32>, vector<8x64xf32>, vector<8x8xf32> -> vector<8x8xf32>
    %cst_40 = arith.constant dense<0xFF800000> : vector<8xf32>
    %112 = vector.multi_reduction <maximumf>, %111, %cst_40 [1] : vector<8x8xf32> to vector<8xf32>
    %113 = vector.shape_cast %112 : vector<8xf32> to vector<8x1xf32>
    %114 = vector.broadcast %113 : vector<8x1xf32> to vector<8x8xf32>
    %115 = arith.subf %111, %114 : vector<8x8xf32>
    %116 = math.exp %115 : vector<8x8xf32>
    %cst_41 = arith.constant dense<0.000000e+00> : vector<8xf32>
    %117 = vector.multi_reduction <add>, %116, %cst_41 [1] : vector<8x8xf32> to vector<8xf32>
    %118 = vector.shape_cast %117 : vector<8xf32> to vector<8x1xf32>
    %119 = vector.broadcast %118 : vector<8x1xf32> to vector<8x8xf32>
    %120 = arith.divf %116, %119 : vector<8x8xf32>
    %cst_42 = arith.constant dense<0.000000e+00> : vector<8x64xf32>
    %121 = tpu.matmul %120, %89, %cst_42 {dimension_numbers = #tpu.dot_dimension_numbers<[1], [0], [0], [1], [0, 0, 1, 1], [], []>} : vector<8x8xf32>, vector<8x64xf32>, vector<8x64xf32> -> vector<8x64xf32>
    %122 = vector.broadcast %108 : vector<1x64xf32> to vector<8x64xf32>
    %123 = arith.mulf %121, %122 : vector<8x64xf32>
    %124 = arith.addf %107, %123 : vector<8x64xf32>
    %c11_43 = arith.constant 11 : index
    %c0_44 = arith.constant 0 : index
    %125 = vector.load %arg5[%c11_43, %c0_44] : memref<16x128xf32, #tpu.memory_space<vmem>>, vector<1x64xf32>
    %126 = vector.broadcast %125 : vector<1x64xf32> to vector<8x64xf32>
    %127 = arith.mulf %88, %126 : vector<8x64xf32>
    %cst_45 = arith.constant dense<0.000000e+00> : vector<8x8xf32>
    %128 = tpu.matmul %87, %127, %cst_45 {dimension_numbers = #tpu.dot_dimension_numbers<[1], [1], [0], [0], [0, 0, 1, 0], [], []>} : vector<8x64xf32>, vector<8x64xf32>, vector<8x8xf32> -> vector<8x8xf32>
    %cst_46 = arith.constant dense<0xFF800000> : vector<8xf32>
    %129 = vector.multi_reduction <maximumf>, %128, %cst_46 [1] : vector<8x8xf32> to vector<8xf32>
    %130 = vector.shape_cast %129 : vector<8xf32> to vector<8x1xf32>
    %131 = vector.broadcast %130 : vector<8x1xf32> to vector<8x8xf32>
    %132 = arith.subf %128, %131 : vector<8x8xf32>
    %133 = math.exp %132 : vector<8x8xf32>
    %cst_47 = arith.constant dense<0.000000e+00> : vector<8xf32>
    %134 = vector.multi_reduction <add>, %133, %cst_47 [1] : vector<8x8xf32> to vector<8xf32>
    %135 = vector.shape_cast %134 : vector<8xf32> to vector<8x1xf32>
    %136 = vector.broadcast %135 : vector<8x1xf32> to vector<8x8xf32>
    %137 = arith.divf %133, %136 : vector<8x8xf32>
    %cst_48 = arith.constant dense<0.000000e+00> : vector<8x64xf32>
    %138 = tpu.matmul %137, %89, %cst_48 {dimension_numbers = #tpu.dot_dimension_numbers<[1], [0], [0], [1], [0, 0, 1, 1], [], []>} : vector<8x8xf32>, vector<8x64xf32>, vector<8x64xf32> -> vector<8x64xf32>
    %139 = vector.broadcast %125 : vector<1x64xf32> to vector<8x64xf32>
    %140 = arith.mulf %138, %139 : vector<8x64xf32>
    %141 = arith.addf %124, %140 : vector<8x64xf32>
    %c11_49 = arith.constant 11 : index
    %c64_50 = arith.constant 64 : index
    %142 = vector.load %arg5[%c11_49, %c64_50] : memref<16x128xf32, #tpu.memory_space<vmem>>, vector<1x64xf32>
    %143 = vector.broadcast %142 : vector<1x64xf32> to vector<8x64xf32>
    %144 = arith.mulf %88, %143 : vector<8x64xf32>
    %cst_51 = arith.constant dense<0.000000e+00> : vector<8x8xf32>
    %145 = tpu.matmul %87, %144, %cst_51 {dimension_numbers = #tpu.dot_dimension_numbers<[1], [1], [0], [0], [0, 0, 1, 0], [], []>} : vector<8x64xf32>, vector<8x64xf32>, vector<8x8xf32> -> vector<8x8xf32>
    %cst_52 = arith.constant dense<0xFF800000> : vector<8xf32>
    %146 = vector.multi_reduction <maximumf>, %145, %cst_52 [1] : vector<8x8xf32> to vector<8xf32>
    %147 = vector.shape_cast %146 : vector<8xf32> to vector<8x1xf32>
    %148 = vector.broadcast %147 : vector<8x1xf32> to vector<8x8xf32>
    %149 = arith.subf %145, %148 : vector<8x8xf32>
    %150 = math.exp %149 : vector<8x8xf32>
    %cst_53 = arith.constant dense<0.000000e+00> : vector<8xf32>
    %151 = vector.multi_reduction <add>, %150, %cst_53 [1] : vector<8x8xf32> to vector<8xf32>
    %152 = vector.shape_cast %151 : vector<8xf32> to vector<8x1xf32>
    %153 = vector.broadcast %152 : vector<8x1xf32> to vector<8x8xf32>
    %154 = arith.divf %150, %153 : vector<8x8xf32>
    %cst_54 = arith.constant dense<0.000000e+00> : vector<8x64xf32>
    %155 = tpu.matmul %154, %89, %cst_54 {dimension_numbers = #tpu.dot_dimension_numbers<[1], [0], [0], [1], [0, 0, 1, 1], [], []>} : vector<8x8xf32>, vector<8x64xf32>, vector<8x64xf32> -> vector<8x64xf32>
    %156 = vector.broadcast %142 : vector<1x64xf32> to vector<8x64xf32>
    %157 = arith.mulf %155, %156 : vector<8x64xf32>
    %158 = arith.addf %141, %157 : vector<8x64xf32>
    %159 = tpu.concatenate %86, %158 in 0 : vector<8x64xf32>, vector<8x64xf32> -> vector<16x64xf32>
    %c0_55 = arith.constant 0 : index
    %c0_56 = arith.constant 0 : index
    %160 = vector.load %arg2[%c0_55, %c0_56] : memref<128x64xf32, #tpu.memory_space<vmem>>, vector<64x64xf32>
    %c1_57 = arith.constant 1 : index
    %c64_58 = arith.constant 64 : index
    %161 = vector.load %arg5[%c1_57, %c64_58] : memref<16x128xf32, #tpu.memory_space<vmem>>, vector<1x64xf32>
    %cst_59 = arith.constant dense<0.000000e+00> : vector<16x64xf32>
    %162 = tpu.matmul %159, %160, %cst_59 {dimension_numbers = #tpu.dot_dimension_numbers<[1], [0], [0], [1], [0, 0, 1, 1], [], []>} : vector<16x64xf32>, vector<64x64xf32>, vector<16x64xf32> -> vector<16x64xf32>
    %163 = vector.broadcast %161 : vector<1x64xf32> to vector<16x64xf32>
    %164 = arith.addf %162, %163 : vector<16x64xf32>
    %165 = arith.addf %0, %164 : vector<16x64xf32>
    %c6 = arith.constant 6 : index
    %c0_60 = arith.constant 0 : index
    %166 = vector.load %arg5[%c6, %c0_60] : memref<16x128xf32, #tpu.memory_space<vmem>>, vector<1x64xf32>
    %c6_61 = arith.constant 6 : index
    %c64_62 = arith.constant 64 : index
    %167 = vector.load %arg5[%c6_61, %c64_62] : memref<16x128xf32, #tpu.memory_space<vmem>>, vector<1x64xf32>
    %cst_63 = arith.constant dense<0.000000e+00> : vector<16xf32>
    %168 = vector.multi_reduction <add>, %165, %cst_63 [1] : vector<16x64xf32> to vector<16xf32>
    %169 = vector.shape_cast %168 : vector<16xf32> to vector<16x1xf32>
    %cst_64 = arith.constant 6.400000e+01 : f32
    %170 = vector.broadcast %cst_64 : f32 to vector<16x1xf32>
    %171 = arith.divf %169, %170 : vector<16x1xf32>
    %172 = vector.broadcast %171 : vector<16x1xf32> to vector<16x64xf32>
    %173 = arith.subf %165, %172 : vector<16x64xf32>
    %174 = arith.mulf %173, %173 : vector<16x64xf32>
    %cst_65 = arith.constant dense<0.000000e+00> : vector<16xf32>
    %175 = vector.multi_reduction <add>, %174, %cst_65 [1] : vector<16x64xf32> to vector<16xf32>
    %176 = vector.shape_cast %175 : vector<16xf32> to vector<16x1xf32>
    %cst_66 = arith.constant 6.400000e+01 : f32
    %177 = vector.broadcast %cst_66 : f32 to vector<16x1xf32>
    %178 = arith.divf %176, %177 : vector<16x1xf32>
    %cst_67 = arith.constant 9.99999974E-6 : f32
    %179 = vector.broadcast %cst_67 : f32 to vector<16x1xf32>
    %180 = arith.addf %178, %179 : vector<16x1xf32>
    %181 = math.rsqrt %180 : vector<16x1xf32>
    %182 = vector.broadcast %181 : vector<16x1xf32> to vector<16x64xf32>
    %183 = arith.mulf %173, %182 : vector<16x64xf32>
    %184 = vector.broadcast %166 : vector<1x64xf32> to vector<16x64xf32>
    %185 = arith.mulf %183, %184 : vector<16x64xf32>
    %186 = vector.broadcast %167 : vector<1x64xf32> to vector<16x64xf32>
    %187 = arith.addf %185, %186 : vector<16x64xf32>
    %c64_68 = arith.constant 64 : index
    %c0_69 = arith.constant 0 : index
    %188 = vector.load %arg1[%c64_68, %c0_69] : memref<128x192xf32, #tpu.memory_space<vmem>>, vector<64x192xf32>
    %cst_70 = arith.constant dense<0.000000e+00> : vector<16x192xf32>
    %189 = tpu.matmul %187, %188, %cst_70 {dimension_numbers = #tpu.dot_dimension_numbers<[1], [0], [0], [1], [0, 0, 1, 1], [], []>} : vector<16x64xf32>, vector<64x192xf32>, vector<16x192xf32> -> vector<16x192xf32>
    %190 = vector.extract_strided_slice %189 {offsets = [0, 0], sizes = [16, 64], strides = [1, 1]} : vector<16x192xf32> to vector<16x64xf32>
    %c2 = arith.constant 2 : index
    %c0_71 = arith.constant 0 : index
    %191 = vector.load %arg5[%c2, %c0_71] : memref<16x128xf32, #tpu.memory_space<vmem>>, vector<1x64xf32>
    %192 = vector.broadcast %191 : vector<1x64xf32> to vector<16x64xf32>
    %193 = arith.addf %190, %192 : vector<16x64xf32>
    %194 = vector.extract_strided_slice %189 {offsets = [0, 64], sizes = [16, 64], strides = [1, 1]} : vector<16x192xf32> to vector<16x64xf32>
    %c2_72 = arith.constant 2 : index
    %c64_73 = arith.constant 64 : index
    %195 = vector.load %arg5[%c2_72, %c64_73] : memref<16x128xf32, #tpu.memory_space<vmem>>, vector<1x64xf32>
    %196 = vector.broadcast %195 : vector<1x64xf32> to vector<16x64xf32>
    %197 = arith.addf %194, %196 : vector<16x64xf32>
    %198 = vector.extract_strided_slice %189 {offsets = [0, 128], sizes = [16, 64], strides = [1, 1]} : vector<16x192xf32> to vector<16x64xf32>
    %c3 = arith.constant 3 : index
    %c0_74 = arith.constant 0 : index
    %199 = vector.load %arg5[%c3, %c0_74] : memref<16x128xf32, #tpu.memory_space<vmem>>, vector<1x64xf32>
    %200 = vector.broadcast %199 : vector<1x64xf32> to vector<16x64xf32>
    %201 = arith.addf %198, %200 : vector<16x64xf32>
    %202 = vector.extract_strided_slice %193 {offsets = [0, 0], sizes = [8, 64], strides = [1, 1]} : vector<16x64xf32> to vector<8x64xf32>
    %203 = vector.extract_strided_slice %197 {offsets = [0, 0], sizes = [8, 64], strides = [1, 1]} : vector<16x64xf32> to vector<8x64xf32>
    %204 = vector.extract_strided_slice %201 {offsets = [0, 0], sizes = [8, 64], strides = [1, 1]} : vector<16x64xf32> to vector<8x64xf32>
    %cst_75 = arith.constant 0.000000e+00 : f32
    %205 = vector.broadcast %cst_75 : f32 to vector<8x64xf32>
    %c12 = arith.constant 12 : index
    %c0_76 = arith.constant 0 : index
    %206 = vector.load %arg5[%c12, %c0_76] : memref<16x128xf32, #tpu.memory_space<vmem>>, vector<1x64xf32>
    %207 = vector.broadcast %206 : vector<1x64xf32> to vector<8x64xf32>
    %208 = arith.mulf %203, %207 : vector<8x64xf32>
    %cst_77 = arith.constant dense<0.000000e+00> : vector<8x8xf32>
    %209 = tpu.matmul %202, %208, %cst_77 {dimension_numbers = #tpu.dot_dimension_numbers<[1], [1], [0], [0], [0, 0, 1, 0], [], []>} : vector<8x64xf32>, vector<8x64xf32>, vector<8x8xf32> -> vector<8x8xf32>
    %cst_78 = arith.constant dense<0xFF800000> : vector<8xf32>
    %210 = vector.multi_reduction <maximumf>, %209, %cst_78 [1] : vector<8x8xf32> to vector<8xf32>
    %211 = vector.shape_cast %210 : vector<8xf32> to vector<8x1xf32>
    %212 = vector.broadcast %211 : vector<8x1xf32> to vector<8x8xf32>
    %213 = arith.subf %209, %212 : vector<8x8xf32>
    %214 = math.exp %213 : vector<8x8xf32>
    %cst_79 = arith.constant dense<0.000000e+00> : vector<8xf32>
    %215 = vector.multi_reduction <add>, %214, %cst_79 [1] : vector<8x8xf32> to vector<8xf32>
    %216 = vector.shape_cast %215 : vector<8xf32> to vector<8x1xf32>
    %217 = vector.broadcast %216 : vector<8x1xf32> to vector<8x8xf32>
    %218 = arith.divf %214, %217 : vector<8x8xf32>
    %cst_80 = arith.constant dense<0.000000e+00> : vector<8x64xf32>
    %219 = tpu.matmul %218, %204, %cst_80 {dimension_numbers = #tpu.dot_dimension_numbers<[1], [0], [0], [1], [0, 0, 1, 1], [], []>} : vector<8x8xf32>, vector<8x64xf32>, vector<8x64xf32> -> vector<8x64xf32>
    %220 = vector.broadcast %206 : vector<1x64xf32> to vector<8x64xf32>
    %221 = arith.mulf %219, %220 : vector<8x64xf32>
    %222 = arith.addf %205, %221 : vector<8x64xf32>
    %c12_81 = arith.constant 12 : index
    %c64_82 = arith.constant 64 : index
    %223 = vector.load %arg5[%c12_81, %c64_82] : memref<16x128xf32, #tpu.memory_space<vmem>>, vector<1x64xf32>
    %224 = vector.broadcast %223 : vector<1x64xf32> to vector<8x64xf32>
    %225 = arith.mulf %203, %224 : vector<8x64xf32>
    %cst_83 = arith.constant dense<0.000000e+00> : vector<8x8xf32>
    %226 = tpu.matmul %202, %225, %cst_83 {dimension_numbers = #tpu.dot_dimension_numbers<[1], [1], [0], [0], [0, 0, 1, 0], [], []>} : vector<8x64xf32>, vector<8x64xf32>, vector<8x8xf32> -> vector<8x8xf32>
    %cst_84 = arith.constant dense<0xFF800000> : vector<8xf32>
    %227 = vector.multi_reduction <maximumf>, %226, %cst_84 [1] : vector<8x8xf32> to vector<8xf32>
    %228 = vector.shape_cast %227 : vector<8xf32> to vector<8x1xf32>
    %229 = vector.broadcast %228 : vector<8x1xf32> to vector<8x8xf32>
    %230 = arith.subf %226, %229 : vector<8x8xf32>
    %231 = math.exp %230 : vector<8x8xf32>
    %cst_85 = arith.constant dense<0.000000e+00> : vector<8xf32>
    %232 = vector.multi_reduction <add>, %231, %cst_85 [1] : vector<8x8xf32> to vector<8xf32>
    %233 = vector.shape_cast %232 : vector<8xf32> to vector<8x1xf32>
    %234 = vector.broadcast %233 : vector<8x1xf32> to vector<8x8xf32>
    %235 = arith.divf %231, %234 : vector<8x8xf32>
    %cst_86 = arith.constant dense<0.000000e+00> : vector<8x64xf32>
    %236 = tpu.matmul %235, %204, %cst_86 {dimension_numbers = #tpu.dot_dimension_numbers<[1], [0], [0], [1], [0, 0, 1, 1], [], []>} : vector<8x8xf32>, vector<8x64xf32>, vector<8x64xf32> -> vector<8x64xf32>
    %237 = vector.broadcast %223 : vector<1x64xf32> to vector<8x64xf32>
    %238 = arith.mulf %236, %237 : vector<8x64xf32>
    %239 = arith.addf %222, %238 : vector<8x64xf32>
    %c13 = arith.constant 13 : index
    %c0_87 = arith.constant 0 : index
    %240 = vector.load %arg5[%c13, %c0_87] : memref<16x128xf32, #tpu.memory_space<vmem>>, vector<1x64xf32>
    %241 = vector.broadcast %240 : vector<1x64xf32> to vector<8x64xf32>
    %242 = arith.mulf %203, %241 : vector<8x64xf32>
    %cst_88 = arith.constant dense<0.000000e+00> : vector<8x8xf32>
    %243 = tpu.matmul %202, %242, %cst_88 {dimension_numbers = #tpu.dot_dimension_numbers<[1], [1], [0], [0], [0, 0, 1, 0], [], []>} : vector<8x64xf32>, vector<8x64xf32>, vector<8x8xf32> -> vector<8x8xf32>
    %cst_89 = arith.constant dense<0xFF800000> : vector<8xf32>
    %244 = vector.multi_reduction <maximumf>, %243, %cst_89 [1] : vector<8x8xf32> to vector<8xf32>
    %245 = vector.shape_cast %244 : vector<8xf32> to vector<8x1xf32>
    %246 = vector.broadcast %245 : vector<8x1xf32> to vector<8x8xf32>
    %247 = arith.subf %243, %246 : vector<8x8xf32>
    %248 = math.exp %247 : vector<8x8xf32>
    %cst_90 = arith.constant dense<0.000000e+00> : vector<8xf32>
    %249 = vector.multi_reduction <add>, %248, %cst_90 [1] : vector<8x8xf32> to vector<8xf32>
    %250 = vector.shape_cast %249 : vector<8xf32> to vector<8x1xf32>
    %251 = vector.broadcast %250 : vector<8x1xf32> to vector<8x8xf32>
    %252 = arith.divf %248, %251 : vector<8x8xf32>
    %cst_91 = arith.constant dense<0.000000e+00> : vector<8x64xf32>
    %253 = tpu.matmul %252, %204, %cst_91 {dimension_numbers = #tpu.dot_dimension_numbers<[1], [0], [0], [1], [0, 0, 1, 1], [], []>} : vector<8x8xf32>, vector<8x64xf32>, vector<8x64xf32> -> vector<8x64xf32>
    %254 = vector.broadcast %240 : vector<1x64xf32> to vector<8x64xf32>
    %255 = arith.mulf %253, %254 : vector<8x64xf32>
    %256 = arith.addf %239, %255 : vector<8x64xf32>
    %c13_92 = arith.constant 13 : index
    %c64_93 = arith.constant 64 : index
    %257 = vector.load %arg5[%c13_92, %c64_93] : memref<16x128xf32, #tpu.memory_space<vmem>>, vector<1x64xf32>
    %258 = vector.broadcast %257 : vector<1x64xf32> to vector<8x64xf32>
    %259 = arith.mulf %203, %258 : vector<8x64xf32>
    %cst_94 = arith.constant dense<0.000000e+00> : vector<8x8xf32>
    %260 = tpu.matmul %202, %259, %cst_94 {dimension_numbers = #tpu.dot_dimension_numbers<[1], [1], [0], [0], [0, 0, 1, 0], [], []>} : vector<8x64xf32>, vector<8x64xf32>, vector<8x8xf32> -> vector<8x8xf32>
    %cst_95 = arith.constant dense<0xFF800000> : vector<8xf32>
    %261 = vector.multi_reduction <maximumf>, %260, %cst_95 [1] : vector<8x8xf32> to vector<8xf32>
    %262 = vector.shape_cast %261 : vector<8xf32> to vector<8x1xf32>
    %263 = vector.broadcast %262 : vector<8x1xf32> to vector<8x8xf32>
    %264 = arith.subf %260, %263 : vector<8x8xf32>
    %265 = math.exp %264 : vector<8x8xf32>
    %cst_96 = arith.constant dense<0.000000e+00> : vector<8xf32>
    %266 = vector.multi_reduction <add>, %265, %cst_96 [1] : vector<8x8xf32> to vector<8xf32>
    %267 = vector.shape_cast %266 : vector<8xf32> to vector<8x1xf32>
    %268 = vector.broadcast %267 : vector<8x1xf32> to vector<8x8xf32>
    %269 = arith.divf %265, %268 : vector<8x8xf32>
    %cst_97 = arith.constant dense<0.000000e+00> : vector<8x64xf32>
    %270 = tpu.matmul %269, %204, %cst_97 {dimension_numbers = #tpu.dot_dimension_numbers<[1], [0], [0], [1], [0, 0, 1, 1], [], []>} : vector<8x8xf32>, vector<8x64xf32>, vector<8x64xf32> -> vector<8x64xf32>
    %271 = vector.broadcast %257 : vector<1x64xf32> to vector<8x64xf32>
    %272 = arith.mulf %270, %271 : vector<8x64xf32>
    %273 = arith.addf %256, %272 : vector<8x64xf32>
    %274 = vector.extract_strided_slice %193 {offsets = [8, 0], sizes = [8, 64], strides = [1, 1]} : vector<16x64xf32> to vector<8x64xf32>
    %275 = vector.extract_strided_slice %197 {offsets = [8, 0], sizes = [8, 64], strides = [1, 1]} : vector<16x64xf32> to vector<8x64xf32>
    %276 = vector.extract_strided_slice %201 {offsets = [8, 0], sizes = [8, 64], strides = [1, 1]} : vector<16x64xf32> to vector<8x64xf32>
    %cst_98 = arith.constant 0.000000e+00 : f32
    %277 = vector.broadcast %cst_98 : f32 to vector<8x64xf32>
    %c12_99 = arith.constant 12 : index
    %c0_100 = arith.constant 0 : index
    %278 = vector.load %arg5[%c12_99, %c0_100] : memref<16x128xf32, #tpu.memory_space<vmem>>, vector<1x64xf32>
    %279 = vector.broadcast %278 : vector<1x64xf32> to vector<8x64xf32>
    %280 = arith.mulf %275, %279 : vector<8x64xf32>
    %cst_101 = arith.constant dense<0.000000e+00> : vector<8x8xf32>
    %281 = tpu.matmul %274, %280, %cst_101 {dimension_numbers = #tpu.dot_dimension_numbers<[1], [1], [0], [0], [0, 0, 1, 0], [], []>} : vector<8x64xf32>, vector<8x64xf32>, vector<8x8xf32> -> vector<8x8xf32>
    %cst_102 = arith.constant dense<0xFF800000> : vector<8xf32>
    %282 = vector.multi_reduction <maximumf>, %281, %cst_102 [1] : vector<8x8xf32> to vector<8xf32>
    %283 = vector.shape_cast %282 : vector<8xf32> to vector<8x1xf32>
    %284 = vector.broadcast %283 : vector<8x1xf32> to vector<8x8xf32>
    %285 = arith.subf %281, %284 : vector<8x8xf32>
    %286 = math.exp %285 : vector<8x8xf32>
    %cst_103 = arith.constant dense<0.000000e+00> : vector<8xf32>
    %287 = vector.multi_reduction <add>, %286, %cst_103 [1] : vector<8x8xf32> to vector<8xf32>
    %288 = vector.shape_cast %287 : vector<8xf32> to vector<8x1xf32>
    %289 = vector.broadcast %288 : vector<8x1xf32> to vector<8x8xf32>
    %290 = arith.divf %286, %289 : vector<8x8xf32>
    %cst_104 = arith.constant dense<0.000000e+00> : vector<8x64xf32>
    %291 = tpu.matmul %290, %276, %cst_104 {dimension_numbers = #tpu.dot_dimension_numbers<[1], [0], [0], [1], [0, 0, 1, 1], [], []>} : vector<8x8xf32>, vector<8x64xf32>, vector<8x64xf32> -> vector<8x64xf32>
    %292 = vector.broadcast %278 : vector<1x64xf32> to vector<8x64xf32>
    %293 = arith.mulf %291, %292 : vector<8x64xf32>
    %294 = arith.addf %277, %293 : vector<8x64xf32>
    %c12_105 = arith.constant 12 : index
    %c64_106 = arith.constant 64 : index
    %295 = vector.load %arg5[%c12_105, %c64_106] : memref<16x128xf32, #tpu.memory_space<vmem>>, vector<1x64xf32>
    %296 = vector.broadcast %295 : vector<1x64xf32> to vector<8x64xf32>
    %297 = arith.mulf %275, %296 : vector<8x64xf32>
    %cst_107 = arith.constant dense<0.000000e+00> : vector<8x8xf32>
    %298 = tpu.matmul %274, %297, %cst_107 {dimension_numbers = #tpu.dot_dimension_numbers<[1], [1], [0], [0], [0, 0, 1, 0], [], []>} : vector<8x64xf32>, vector<8x64xf32>, vector<8x8xf32> -> vector<8x8xf32>
    %cst_108 = arith.constant dense<0xFF800000> : vector<8xf32>
    %299 = vector.multi_reduction <maximumf>, %298, %cst_108 [1] : vector<8x8xf32> to vector<8xf32>
    %300 = vector.shape_cast %299 : vector<8xf32> to vector<8x1xf32>
    %301 = vector.broadcast %300 : vector<8x1xf32> to vector<8x8xf32>
    %302 = arith.subf %298, %301 : vector<8x8xf32>
    %303 = math.exp %302 : vector<8x8xf32>
    %cst_109 = arith.constant dense<0.000000e+00> : vector<8xf32>
    %304 = vector.multi_reduction <add>, %303, %cst_109 [1] : vector<8x8xf32> to vector<8xf32>
    %305 = vector.shape_cast %304 : vector<8xf32> to vector<8x1xf32>
    %306 = vector.broadcast %305 : vector<8x1xf32> to vector<8x8xf32>
    %307 = arith.divf %303, %306 : vector<8x8xf32>
    %cst_110 = arith.constant dense<0.000000e+00> : vector<8x64xf32>
    %308 = tpu.matmul %307, %276, %cst_110 {dimension_numbers = #tpu.dot_dimension_numbers<[1], [0], [0], [1], [0, 0, 1, 1], [], []>} : vector<8x8xf32>, vector<8x64xf32>, vector<8x64xf32> -> vector<8x64xf32>
    %309 = vector.broadcast %295 : vector<1x64xf32> to vector<8x64xf32>
    %310 = arith.mulf %308, %309 : vector<8x64xf32>
    %311 = arith.addf %294, %310 : vector<8x64xf32>
    %c13_111 = arith.constant 13 : index
    %c0_112 = arith.constant 0 : index
    %312 = vector.load %arg5[%c13_111, %c0_112] : memref<16x128xf32, #tpu.memory_space<vmem>>, vector<1x64xf32>
    %313 = vector.broadcast %312 : vector<1x64xf32> to vector<8x64xf32>
    %314 = arith.mulf %275, %313 : vector<8x64xf32>
    %cst_113 = arith.constant dense<0.000000e+00> : vector<8x8xf32>
    %315 = tpu.matmul %274, %314, %cst_113 {dimension_numbers = #tpu.dot_dimension_numbers<[1], [1], [0], [0], [0, 0, 1, 0], [], []>} : vector<8x64xf32>, vector<8x64xf32>, vector<8x8xf32> -> vector<8x8xf32>
    %cst_114 = arith.constant dense<0xFF800000> : vector<8xf32>
    %316 = vector.multi_reduction <maximumf>, %315, %cst_114 [1] : vector<8x8xf32> to vector<8xf32>
    %317 = vector.shape_cast %316 : vector<8xf32> to vector<8x1xf32>
    %318 = vector.broadcast %317 : vector<8x1xf32> to vector<8x8xf32>
    %319 = arith.subf %315, %318 : vector<8x8xf32>
    %320 = math.exp %319 : vector<8x8xf32>
    %cst_115 = arith.constant dense<0.000000e+00> : vector<8xf32>
    %321 = vector.multi_reduction <add>, %320, %cst_115 [1] : vector<8x8xf32> to vector<8xf32>
    %322 = vector.shape_cast %321 : vector<8xf32> to vector<8x1xf32>
    %323 = vector.broadcast %322 : vector<8x1xf32> to vector<8x8xf32>
    %324 = arith.divf %320, %323 : vector<8x8xf32>
    %cst_116 = arith.constant dense<0.000000e+00> : vector<8x64xf32>
    %325 = tpu.matmul %324, %276, %cst_116 {dimension_numbers = #tpu.dot_dimension_numbers<[1], [0], [0], [1], [0, 0, 1, 1], [], []>} : vector<8x8xf32>, vector<8x64xf32>, vector<8x64xf32> -> vector<8x64xf32>
    %326 = vector.broadcast %312 : vector<1x64xf32> to vector<8x64xf32>
    %327 = arith.mulf %325, %326 : vector<8x64xf32>
    %328 = arith.addf %311, %327 : vector<8x64xf32>
    %c13_117 = arith.constant 13 : index
    %c64_118 = arith.constant 64 : index
    %329 = vector.load %arg5[%c13_117, %c64_118] : memref<16x128xf32, #tpu.memory_space<vmem>>, vector<1x64xf32>
    %330 = vector.broadcast %329 : vector<1x64xf32> to vector<8x64xf32>
    %331 = arith.mulf %275, %330 : vector<8x64xf32>
    %cst_119 = arith.constant dense<0.000000e+00> : vector<8x8xf32>
    %332 = tpu.matmul %274, %331, %cst_119 {dimension_numbers = #tpu.dot_dimension_numbers<[1], [1], [0], [0], [0, 0, 1, 0], [], []>} : vector<8x64xf32>, vector<8x64xf32>, vector<8x8xf32> -> vector<8x8xf32>
    %cst_120 = arith.constant dense<0xFF800000> : vector<8xf32>
    %333 = vector.multi_reduction <maximumf>, %332, %cst_120 [1] : vector<8x8xf32> to vector<8xf32>
    %334 = vector.shape_cast %333 : vector<8xf32> to vector<8x1xf32>
    %335 = vector.broadcast %334 : vector<8x1xf32> to vector<8x8xf32>
    %336 = arith.subf %332, %335 : vector<8x8xf32>
    %337 = math.exp %336 : vector<8x8xf32>
    %cst_121 = arith.constant dense<0.000000e+00> : vector<8xf32>
    %338 = vector.multi_reduction <add>, %337, %cst_121 [1] : vector<8x8xf32> to vector<8xf32>
    %339 = vector.shape_cast %338 : vector<8xf32> to vector<8x1xf32>
    %340 = vector.broadcast %339 : vector<8x1xf32> to vector<8x8xf32>
    %341 = arith.divf %337, %340 : vector<8x8xf32>
    %cst_122 = arith.constant dense<0.000000e+00> : vector<8x64xf32>
    %342 = tpu.matmul %341, %276, %cst_122 {dimension_numbers = #tpu.dot_dimension_numbers<[1], [0], [0], [1], [0, 0, 1, 1], [], []>} : vector<8x8xf32>, vector<8x64xf32>, vector<8x64xf32> -> vector<8x64xf32>
    %343 = vector.broadcast %329 : vector<1x64xf32> to vector<8x64xf32>
    %344 = arith.mulf %342, %343 : vector<8x64xf32>
    %345 = arith.addf %328, %344 : vector<8x64xf32>
    %346 = tpu.concatenate %273, %345 in 0 : vector<8x64xf32>, vector<8x64xf32> -> vector<16x64xf32>
    %c64_123 = arith.constant 64 : index
    %c0_124 = arith.constant 0 : index
    %347 = vector.load %arg2[%c64_123, %c0_124] : memref<128x64xf32, #tpu.memory_space<vmem>>, vector<64x64xf32>
    %c3_125 = arith.constant 3 : index
    %c64_126 = arith.constant 64 : index
    %348 = vector.load %arg5[%c3_125, %c64_126] : memref<16x128xf32, #tpu.memory_space<vmem>>, vector<1x64xf32>
    %cst_127 = arith.constant dense<0.000000e+00> : vector<16x64xf32>
    %349 = tpu.matmul %346, %347, %cst_127 {dimension_numbers = #tpu.dot_dimension_numbers<[1], [0], [0], [1], [0, 0, 1, 1], [], []>} : vector<16x64xf32>, vector<64x64xf32>, vector<16x64xf32> -> vector<16x64xf32>
    %350 = vector.broadcast %348 : vector<1x64xf32> to vector<16x64xf32>
    %351 = arith.addf %349, %350 : vector<16x64xf32>
    %352 = arith.addf %187, %351 : vector<16x64xf32>
    %c7 = arith.constant 7 : index
    %c0_128 = arith.constant 0 : index
    %353 = vector.load %arg5[%c7, %c0_128] : memref<16x128xf32, #tpu.memory_space<vmem>>, vector<1x64xf32>
    %c7_129 = arith.constant 7 : index
    %c64_130 = arith.constant 64 : index
    %354 = vector.load %arg5[%c7_129, %c64_130] : memref<16x128xf32, #tpu.memory_space<vmem>>, vector<1x64xf32>
    %cst_131 = arith.constant dense<0.000000e+00> : vector<16xf32>
    %355 = vector.multi_reduction <add>, %352, %cst_131 [1] : vector<16x64xf32> to vector<16xf32>
    %356 = vector.shape_cast %355 : vector<16xf32> to vector<16x1xf32>
    %cst_132 = arith.constant 6.400000e+01 : f32
    %357 = vector.broadcast %cst_132 : f32 to vector<16x1xf32>
    %358 = arith.divf %356, %357 : vector<16x1xf32>
    %359 = vector.broadcast %358 : vector<16x1xf32> to vector<16x64xf32>
    %360 = arith.subf %352, %359 : vector<16x64xf32>
    %361 = arith.mulf %360, %360 : vector<16x64xf32>
    %cst_133 = arith.constant dense<0.000000e+00> : vector<16xf32>
    %362 = vector.multi_reduction <add>, %361, %cst_133 [1] : vector<16x64xf32> to vector<16xf32>
    %363 = vector.shape_cast %362 : vector<16xf32> to vector<16x1xf32>
    %cst_134 = arith.constant 6.400000e+01 : f32
    %364 = vector.broadcast %cst_134 : f32 to vector<16x1xf32>
    %365 = arith.divf %363, %364 : vector<16x1xf32>
    %cst_135 = arith.constant 9.99999974E-6 : f32
    %366 = vector.broadcast %cst_135 : f32 to vector<16x1xf32>
    %367 = arith.addf %365, %366 : vector<16x1xf32>
    %368 = math.rsqrt %367 : vector<16x1xf32>
    %369 = vector.broadcast %368 : vector<16x1xf32> to vector<16x64xf32>
    %370 = arith.mulf %360, %369 : vector<16x64xf32>
    %371 = vector.broadcast %353 : vector<1x64xf32> to vector<16x64xf32>
    %372 = arith.mulf %370, %371 : vector<16x64xf32>
    %373 = vector.broadcast %354 : vector<1x64xf32> to vector<16x64xf32>
    %374 = arith.addf %372, %373 : vector<16x64xf32>
    %c0_136 = arith.constant 0 : index
    %c0_137 = arith.constant 0 : index
    %375 = vector.load %arg3[%c0_136, %c0_137] : memref<64x128xf32, #tpu.memory_space<vmem>>, vector<64x128xf32>
    %cst_138 = arith.constant dense<0.000000e+00> : vector<16x128xf32>
    %376 = tpu.matmul %374, %375, %cst_138 {dimension_numbers = #tpu.dot_dimension_numbers<[1], [0], [0], [1], [0, 0, 1, 1], [], []>} : vector<16x64xf32>, vector<64x128xf32>, vector<16x128xf32> -> vector<16x128xf32>
    %c4 = arith.constant 4 : index
    %c0_139 = arith.constant 0 : index
    %377 = vector.load %arg5[%c4, %c0_139] : memref<16x128xf32, #tpu.memory_space<vmem>>, vector<1x128xf32>
    %378 = vector.broadcast %377 : vector<1x128xf32> to vector<16x128xf32>
    %379 = arith.addf %376, %378 : vector<16x128xf32>
    %cst_140 = arith.constant 5.000000e-01 : f32
    %380 = vector.broadcast %cst_140 : f32 to vector<16x128xf32>
    %381 = arith.mulf %380, %379 : vector<16x128xf32>
    %cst_141 = arith.constant 0.707106769 : f32
    %382 = vector.broadcast %cst_141 : f32 to vector<16x128xf32>
    %383 = arith.mulf %379, %382 : vector<16x128xf32>
    %cst_142 = arith.constant 0.000000e+00 : f32
    %384 = vector.broadcast %cst_142 : f32 to vector<16x128xf32>
    %385 = arith.cmpf oge, %383, %384 : vector<16x128xf32>
    %cst_143 = arith.constant 1.000000e+00 : f32
    %cst_144 = arith.constant -1.000000e+00 : f32
    %386 = vector.broadcast %cst_143 : f32 to vector<16x128xf32>
    %387 = vector.broadcast %cst_144 : f32 to vector<16x128xf32>
    %388 = arith.select %385, %386, %387 : vector<16x128xi1>, vector<16x128xf32>
    %389 = math.absf %383 : vector<16x128xf32>
    %cst_145 = arith.constant 0.327591091 : f32
    %390 = vector.broadcast %cst_145 : f32 to vector<16x128xf32>
    %391 = arith.mulf %390, %389 : vector<16x128xf32>
    %cst_146 = arith.constant 1.000000e+00 : f32
    %392 = vector.broadcast %cst_146 : f32 to vector<16x128xf32>
    %393 = arith.addf %392, %391 : vector<16x128xf32>
    %cst_147 = arith.constant 1.000000e+00 : f32
    %394 = vector.broadcast %cst_147 : f32 to vector<16x128xf32>
    %395 = arith.divf %394, %393 : vector<16x128xf32>
    %cst_148 = arith.constant 1.06140542 : f32
    %396 = vector.broadcast %cst_148 : f32 to vector<16x128xf32>
    %397 = arith.mulf %396, %395 : vector<16x128xf32>
    %cst_149 = arith.constant -1.45315206 : f32
    %398 = vector.broadcast %cst_149 : f32 to vector<16x128xf32>
    %399 = arith.addf %397, %398 : vector<16x128xf32>
    %400 = arith.mulf %399, %395 : vector<16x128xf32>
    %cst_150 = arith.constant 1.42141378 : f32
    %401 = vector.broadcast %cst_150 : f32 to vector<16x128xf32>
    %402 = arith.addf %400, %401 : vector<16x128xf32>
    %403 = arith.mulf %402, %395 : vector<16x128xf32>
    %cst_151 = arith.constant -0.284496725 : f32
    %404 = vector.broadcast %cst_151 : f32 to vector<16x128xf32>
    %405 = arith.addf %403, %404 : vector<16x128xf32>
    %406 = arith.mulf %405, %395 : vector<16x128xf32>
    %cst_152 = arith.constant 0.254829586 : f32
    %407 = vector.broadcast %cst_152 : f32 to vector<16x128xf32>
    %408 = arith.addf %406, %407 : vector<16x128xf32>
    %409 = arith.mulf %408, %395 : vector<16x128xf32>
    %cst_153 = arith.constant 0.000000e+00 : f32
    %410 = vector.broadcast %cst_153 : f32 to vector<16x128xf32>
    %411 = arith.subf %410, %389 : vector<16x128xf32>
    %412 = arith.mulf %411, %389 : vector<16x128xf32>
    %413 = math.exp %412 : vector<16x128xf32>
    %414 = arith.mulf %409, %413 : vector<16x128xf32>
    %cst_154 = arith.constant 1.000000e+00 : f32
    %415 = vector.broadcast %cst_154 : f32 to vector<16x128xf32>
    %416 = arith.subf %415, %414 : vector<16x128xf32>
    %417 = arith.mulf %388, %416 : vector<16x128xf32>
    %cst_155 = arith.constant 1.000000e+00 : f32
    %418 = vector.broadcast %cst_155 : f32 to vector<16x128xf32>
    %419 = arith.addf %418, %417 : vector<16x128xf32>
    %420 = arith.mulf %381, %419 : vector<16x128xf32>
    %c0_156 = arith.constant 0 : index
    %c0_157 = arith.constant 0 : index
    %421 = vector.load %arg4[%c0_156, %c0_157] : memref<128x64xf32, #tpu.memory_space<vmem>>, vector<128x64xf32>
    %cst_158 = arith.constant dense<0.000000e+00> : vector<16x64xf32>
    %422 = tpu.matmul %420, %421, %cst_158 {dimension_numbers = #tpu.dot_dimension_numbers<[1], [0], [0], [1], [0, 0, 1, 1], [], []>} : vector<16x128xf32>, vector<128x64xf32>, vector<16x64xf32> -> vector<16x64xf32>
    %c5 = arith.constant 5 : index
    %c0_159 = arith.constant 0 : index
    %423 = vector.load %arg5[%c5, %c0_159] : memref<16x128xf32, #tpu.memory_space<vmem>>, vector<1x64xf32>
    %424 = vector.broadcast %423 : vector<1x64xf32> to vector<16x64xf32>
    %425 = arith.addf %422, %424 : vector<16x64xf32>
    %426 = arith.addf %425, %374 : vector<16x64xf32>
    %c8 = arith.constant 8 : index
    %c0_160 = arith.constant 0 : index
    %427 = vector.load %arg5[%c8, %c0_160] : memref<16x128xf32, #tpu.memory_space<vmem>>, vector<1x64xf32>
    %c8_161 = arith.constant 8 : index
    %c64_162 = arith.constant 64 : index
    %428 = vector.load %arg5[%c8_161, %c64_162] : memref<16x128xf32, #tpu.memory_space<vmem>>, vector<1x64xf32>
    %cst_163 = arith.constant dense<0.000000e+00> : vector<16xf32>
    %429 = vector.multi_reduction <add>, %426, %cst_163 [1] : vector<16x64xf32> to vector<16xf32>
    %430 = vector.shape_cast %429 : vector<16xf32> to vector<16x1xf32>
    %cst_164 = arith.constant 6.400000e+01 : f32
    %431 = vector.broadcast %cst_164 : f32 to vector<16x1xf32>
    %432 = arith.divf %430, %431 : vector<16x1xf32>
    %433 = vector.broadcast %432 : vector<16x1xf32> to vector<16x64xf32>
    %434 = arith.subf %426, %433 : vector<16x64xf32>
    %435 = arith.mulf %434, %434 : vector<16x64xf32>
    %cst_165 = arith.constant dense<0.000000e+00> : vector<16xf32>
    %436 = vector.multi_reduction <add>, %435, %cst_165 [1] : vector<16x64xf32> to vector<16xf32>
    %437 = vector.shape_cast %436 : vector<16xf32> to vector<16x1xf32>
    %cst_166 = arith.constant 6.400000e+01 : f32
    %438 = vector.broadcast %cst_166 : f32 to vector<16x1xf32>
    %439 = arith.divf %437, %438 : vector<16x1xf32>
    %cst_167 = arith.constant 9.99999974E-6 : f32
    %440 = vector.broadcast %cst_167 : f32 to vector<16x1xf32>
    %441 = arith.addf %439, %440 : vector<16x1xf32>
    %442 = math.rsqrt %441 : vector<16x1xf32>
    %443 = vector.broadcast %442 : vector<16x1xf32> to vector<16x64xf32>
    %444 = arith.mulf %434, %443 : vector<16x64xf32>
    %445 = vector.broadcast %427 : vector<1x64xf32> to vector<16x64xf32>
    %446 = arith.mulf %444, %445 : vector<16x64xf32>
    %447 = vector.broadcast %428 : vector<1x64xf32> to vector<16x64xf32>
    %448 = arith.addf %446, %447 : vector<16x64xf32>
    %449 = arith.addf %374, %448 : vector<16x64xf32>
    %c9 = arith.constant 9 : index
    %c0_168 = arith.constant 0 : index
    %450 = vector.load %arg5[%c9, %c0_168] : memref<16x128xf32, #tpu.memory_space<vmem>>, vector<1x64xf32>
    %c9_169 = arith.constant 9 : index
    %c64_170 = arith.constant 64 : index
    %451 = vector.load %arg5[%c9_169, %c64_170] : memref<16x128xf32, #tpu.memory_space<vmem>>, vector<1x64xf32>
    %cst_171 = arith.constant dense<0.000000e+00> : vector<16xf32>
    %452 = vector.multi_reduction <add>, %449, %cst_171 [1] : vector<16x64xf32> to vector<16xf32>
    %453 = vector.shape_cast %452 : vector<16xf32> to vector<16x1xf32>
    %cst_172 = arith.constant 6.400000e+01 : f32
    %454 = vector.broadcast %cst_172 : f32 to vector<16x1xf32>
    %455 = arith.divf %453, %454 : vector<16x1xf32>
    %456 = vector.broadcast %455 : vector<16x1xf32> to vector<16x64xf32>
    %457 = arith.subf %449, %456 : vector<16x64xf32>
    %458 = arith.mulf %457, %457 : vector<16x64xf32>
    %cst_173 = arith.constant dense<0.000000e+00> : vector<16xf32>
    %459 = vector.multi_reduction <add>, %458, %cst_173 [1] : vector<16x64xf32> to vector<16xf32>
    %460 = vector.shape_cast %459 : vector<16xf32> to vector<16x1xf32>
    %cst_174 = arith.constant 6.400000e+01 : f32
    %461 = vector.broadcast %cst_174 : f32 to vector<16x1xf32>
    %462 = arith.divf %460, %461 : vector<16x1xf32>
    %cst_175 = arith.constant 9.99999974E-6 : f32
    %463 = vector.broadcast %cst_175 : f32 to vector<16x1xf32>
    %464 = arith.addf %462, %463 : vector<16x1xf32>
    %465 = math.rsqrt %464 : vector<16x1xf32>
    %466 = vector.broadcast %465 : vector<16x1xf32> to vector<16x64xf32>
    %467 = arith.mulf %457, %466 : vector<16x64xf32>
    %468 = vector.broadcast %450 : vector<1x64xf32> to vector<16x64xf32>
    %469 = arith.mulf %467, %468 : vector<16x64xf32>
    %470 = vector.broadcast %451 : vector<1x64xf32> to vector<16x64xf32>
    %471 = arith.addf %469, %470 : vector<16x64xf32>
    %c0_176 = arith.constant 0 : index
    %c0_177 = arith.constant 0 : index
    %472 = vector.load %arg6[%c0_176, %c0_177] : memref<16x64xf32, #tpu.memory_space<vmem>>, vector<16x64xf32>
    tpu.vector_store %arg6[%c0_176, %c0_177], %471 {strides = array<i32>} : memref<16x64xf32, #tpu.memory_space<vmem>>, vector<16x64xf32>,
    return
  }
}

</mosaic_0001>

<bundles_post_ra>
// kernel: tpu_custom_call.1
= control target key start
LH: loop header
LB: loop body
LE: loop exit
PB: predicated region body
PF: predicated region fallthrough
CT: control target
= control target key end

     0   :  { %v4174_v7 = vmov 0.0   ;;  %s4859_s0 = inlined_call_operand.vmem [shape: f32[16,64], index: 0, kind: input, shape index: {}]   ;;  %s4860_s1 = inlined_call_operand.vmem [shape: f32[128,192], index: 1, kind: input, shape index: {}]   ;;  %s4861_s2 = inlined_call_operand.vmem [shape: f32[128,64], index: 2, kind: input, shape index: {}]   ;;  %s4862_s3 = inlined_call_operand.vmem [shape: f32[64,128], index: 3, kind: input, shape index: {}]   ;;  %s4863_s4 = inlined_call_operand.vmem [shape: f32[128,64], index: 4, kind: input, shape index: {}]   ;;  %s4864_s5 = inlined_call_operand.vmem [shape: f32[16,128], index: 5, kind: input, shape index: {}]   ;;  %s4865_s6 = inlined_call_operand.hbm [shape: f32[16,64], index: 6, kind: output, shape index: {}]  }
   0x1   :  { %v27_v0 = vld [vmem:[%s4860_s1 + $0x8] sm:$0xff]  ;;  %v29_v1 = vld [vmem:[%s4860_s1 + $0x18] sm:$0xff]  ;;  %v26_v2 = vld [vmem:[%s4860_s1] sm:$0xff]  ;;  %113 = vmatprep.mubr.f32.mxu0 %v4174_v7  ;;  %3691 = vmatprep.subr.mxu1 %v4174_v7 }
   0x2   :  { %v3943_v3 = vpack.c.bf16 %v29_v1, %v27_v0  ;;  %v28_v4 = vld [vmem:[%s4860_s1 + $0x10] sm:$0xff]  ;;  %v31_v5 = vld [vmem:[%s4860_s1 + $0x28] sm:$0xff]  ;;  %v33_v6 = vld [vmem:[%s4860_s1 + $0x38] sm:$0xff] }
   0x3   :  { %v3945_v8 = vpack.c.bf16 %v28_v4, %v26_v2  ;;  %v3947_v9 = vpack.c.bf16 %v33_v6, %v31_v5  ;;  %v30_v10 = vld [vmem:[%s4860_s1 + $0x20] sm:$0xff]  ;;  %v32_v11 = vld [vmem:[%s4860_s1 + $0x30] sm:$0xff]  ;;  %v35_v12 = vld [vmem:[%s4860_s1 + $0x48] sm:$0xff] }
   0x4   :  { %3944 = vmatprep.subr.bf16.mxu0 %v3943_v3  ;;  %v37_v13 = vld [vmem:[%s4860_s1 + $0x58] sm:$0xff]  ;;  %v3949_v14 = vpack.c.bf16 %v32_v11, %v30_v10  ;;  %v34_v16 = vld [vmem:[%s4860_s1 + $0x40] sm:$0xff]  ;;  %v36_v17 = vld [vmem:[%s4860_s1 + $0x50] sm:$0xff] }
   0x5   :  { %3946 = vmatpush1.bf16.msra.mxu0 %v3945_v8  ;;  %v3951_v15 = vpack.c.bf16 %v37_v13, %v35_v12  ;;  %v39_v18 = vld [vmem:[%s4860_s1 + $0x68] sm:$0xff]  ;;  %v41_v19 = vld [vmem:[%s4860_s1 + $0x78] sm:$0xff] }
   0x6   :  { %3948 = vmatprep.subr.bf16.mxu0 %v3947_v9  ;;  %v4263_v20 = vld [vmem:[%s4864_s5 + $0xa] ss:$0 sm:$0xff] }
   0x7   :  { %11 = vsyncpa [#allocation3], 0  ;;  %s4175_s27 = smov 64   ;;  %v3953_v21 = vpack.c.bf16 %v36_v17, %v34_v16  ;;  %v3955_v22 = vpack.c.bf16 %v41_v19, %v39_v18  ;;  %v38_v23 = vld [vmem:[%s4860_s1 + $0x60] sm:$0xff]  ;;  %v40_v24 = vld [vmem:[%s4860_s1 + $0x70] sm:$0xff]  ;;  %vm42_vm0 = vcmask 523264  }
   0x8   :  { %146 = vrot.lane.b32.xlu0 %v4263_v20, %s4175_s27  ;;  %v3957_v25 = vpack.c.bf16 %v40_v24, %v38_v23  ;;  %v4276_v26 = vld [vmem:[%s4859_s0] sm:$0xff]  ;;  %v4285_v27 = vld [vmem:[%s4859_s0 + $0x8] sm:$0xff]  ;;  %vm4176_vm1 = vmmov 0   ;;  %vm228_vm2 = vcmask 64512   ;;  %s4178_s20 = smov [#allocation2]  }
   0x9   :  { %3950 = vmatpush1.bf16.msra.mxu0 %v3949_v14  ;;  %3693 = vmatprep.mubr.msk.f32.mxu1 %vm4176_vm1, %v4174_v7  ;;  %v3509_v28 = vld [vmem:[%s4864_s5] ss:$0 sm:$0xff]  ;;  %v4299_v29 = vld [vmem:[%s4864_s5 + $0x1] ss:$0 sm:$0xff]  ;;  %v4321_v39 = vld [vmem:[%s4864_s5 + $0xb] ss:$0 sm:$0xff] }
   0xa   :  { %3952 = vmatprep.subr.bf16.mxu0 %v3951_v15  ;;  %s3496_s21 = sshll.u32 %s4178_s20, 4  ;;  %s3497_s21 = int_to_ptr.vmem [resolvable:$true] %s3496_s21 }
   0xb   :  { %p4155_p1 = scmp.lt.s32.totalorder %s3497_s21, %s3497_s21 }
   0xd   :  { %3954 = vmatpush1.bf16.msra.mxu0 %v3953_v21 }
   0xe   :  { %3956 = vmatprep.subr.bf16.mxu0 %v3955_v22 }
  0x11   :  { %3958 = vmatpush1.bf16.msra.mxu0 %v3957_v25 }
  0x12   :  { %3716 = vmatprep.subr.mxu0 %v4174_v7 }
  0x14   :  { %3507 = vmatmul.mubr.msk.f32.vlgmr.msra.gmra.mrb[0].mxu0 %vm42_vm0, %v4276_v26 }
  0x15   :  { %119 = vmatprep.mubr.f32.mxu0 %v4174_v7 }
  0x18   :  { %3508 = vmatmul.mubr.msk.f32.gmra.mrb[2].mxu0 %vm42_vm0, %v4285_v27 }
  0x19   :  { %3718 = vmatprep.mubr.msk.f32.mxu0 %vm4176_vm1, %v4174_v7 }
  0x7a   :  { %v4301_v31 = vpop.permute.xlu0 %146 }
  0xe7   :  { %v115_v30 = vpop.f32.mrb[0].mxu0 }
  0xe8   :  { %v4303_v32 = vadd.f32 %v3509_v28, %v115_v30  ;;  %v117_v33 = vpop.f32.mrb[1].mxu0 }
  0xe9   :  { %v4306_v34 = vadd.f32 %v4299_v29, %v117_v33 }
  0xea   :  { %v149_v35 = vmul.f32 %v4301_v31, %v4303_v32  ;;  %v315_v38 = vmul.f32 %v4263_v20, %v4303_v32  ;;  %v648_v6 = vmul.f32 %v4321_v39, %v4303_v32 }
  0xeb   :  { %v121_v36 = vpop.f32.mrb[2].mxu0  ;;  %3717 = vmatpush3.msra.mxu0 %v4306_v34 }
  0xec   :  { %v4311_v37 = vadd.f32 %v3509_v28, %v121_v36  ;;  %151 = vrot.lane.b32.xlu0 %v149_v35, %s4175_s27  ;;  %3726 = vmatprep.subr.mxu0 %v4174_v7  ;;  %v4357_v62 = vpop.f32.mrb[3].mxu0 }
  0xee   :  { %v810_v44 = vmul.f32 %v4301_v31, %v4311_v37  ;;  %v975_v61 = vmul.f32 %v4263_v20, %v4311_v37  ;;  %v1299_v0 = vmul.f32 %v4321_v39, %v4311_v37 }
  0xf0   :  { %317 = vrot.lane.b32.xlu0 %v315_v38, %s4175_s27 }
  0xf4   :  { %483 = vrot.lane.b32.xlu0 %v4321_v39, %s4175_s27 }
 0x15e   :  { %v152_v40 = vpop.permute.xlu0 %151 }
 0x15f   :  { %3692 = vmatpush3.xpose.msk.msra.mxu1 %vm42_vm0, %v152_v40 }
 0x160   :  { %3696 = vmatprep.subr.mxu1 %v4174_v7 }
 0x162   :  { %3694 = vmatmul.mubr.msk.f32.vlgmr.msra.gmra.mrb[0].mxu1 %vm42_vm0, %v4303_v32  ;;  %v318_v41 = vpop.permute.xlu0 %317 }
 0x163   :  { %3697 = vmatpush3.msra.mxu1 %v4306_v34  ;;  %3698 = vmatprep.mubr.msk.f32.mxu1 %vm4176_vm1, %v4174_v7 }
 0x164   :  { %3701 = vmatprep.subr.mxu1 %v4174_v7 }
 0x166   :  { %v4333_v42 = vpop.permute.xlu0 %483 }
 0x167   :  { %v486_v43 = vmul.f32 %v4333_v42, %v4303_v32  ;;  %v1137_v63 = vmul.f32 %v4333_v42, %v4311_v37 }
 0x169   :  { %488 = vrot.lane.b32.xlu0 %v486_v43, %s4175_s27 }
 0x16d   :  { %812 = vrot.lane.b32.xlu0 %v810_v44, %s4175_s27 }
 0x171   :  { %977 = vrot.lane.b32.xlu0 %v975_v61, %s4175_s27 }
 0x175   :  { %1139 = vrot.lane.b32.xlu0 %v1137_v63, %s4175_s27 }
 0x179   :  { %1301 = vrot.lane.b32.xlu0 %v1299_v0, %s4175_s27 }
 0x1db   :  { %v489_v11 = vpop.permute.xlu0 %488 }
 0x1df   :  { %v813_v13 = vpop.permute.xlu0 %812 }
 0x1e3   :  { %v978_v14 = vpop.permute.xlu0 %977 }
 0x1e7   :  { %v1140_v15 = vpop.permute.xlu0 %1139 }
 0x1eb   :  { %v1302_v16 = vpop.permute.xlu0 %1301 }
 0x235   :  { %v224_v45 = vpop.f32.mrb[0].mxu1 }
 0x236   :  { %v3695_v46 = vpop.f32.mrb[1].mxu1  ;;  %v229_v47 = vsel %vm228_vm2, %v224_v45, -inf }
 0x237   :  { %230 = vmax.xlane.f32.xlu1 %v229_v47 }
 0x2c4   :  { %v231_v48 = vpop.xlane.xlu1 %230 }
 0x2c5   :  { %v232_v49 = vsub.f32 %v224_v45, %v231_v48 }
 0x2c7   :  { %v233_v50 = vmul.f32 1.442695, %v232_v49 }
 0x2c9   :  { %4062 = vpow2.f32 %v233_v50 }
 0x2d3   :  { %v4063_v51 = vpop.eup %4062 }
 0x2d4   :  { %v235_v52 = vsel %vm228_vm2, %v4063_v51, 0.0 }
 0x2d5   :  { %236 = vadd.xlane.f32.xlu1 %v235_v52 }
 0x362   :  { %v237_v53 = vpop.xlane.xlu1 %236 }
 0x363   :  { %4064 = vrcp.f32 %v237_v53 }
 0x36d   :  { %v4065_v54 = vpop.eup %4064 }
 0x36e   :  { %v239_v55 = vmul.f32 %v4065_v54, %v4063_v51 }
 0x370   :  { %3699 = vmatmul.mubr.msk.f32.vlgmr.msra.gmra.mrb[2].mxu1 %vm228_vm2, %v239_v55 }
 0x371   :  { %3702 = vmatpush3.xpose.msk.msra.mxu1 %vm42_vm0, %v318_v41  ;;  %3703 = vmatprep.mubr.msk.f32.mxu1 %vm4176_vm1, %v4174_v7 }
 0x372   :  { %3706 = vmatprep.subr.mxu1 %v4174_v7 }
 0x374   :  { %3704 = vmatmul.mubr.msk.f32.vlgmr.msra.gmra.mrb[4].mxu1 %vm42_vm0, %v4303_v32 }
 0x375   :  { %3707 = vmatpush3.msra.mxu1 %v4306_v34  ;;  %3708 = vmatprep.mubr.msk.f32.mxu1 %vm4176_vm1, %v4174_v7 }
 0x376   :  { %3711 = vmatprep.subr.mxu1 %v4174_v7 }
 0x443   :  { %v309_v56 = vpop.f32.mrb[2].mxu1 }
 0x444   :  { %v3700_v57 = vpop.f32.mrb[3].mxu1  ;;  %v313_v18 = vmul.f32 %v4263_v20, %v309_v56 }
 0x447   :  { %v387_v58 = vpop.f32.mrb[4].mxu1 }
 0x448   :  { %v3705_v59 = vpop.f32.mrb[5].mxu1  ;;  %v391_v60 = vsel %vm228_vm2, %v387_v58, -inf }
 0x449   :  { %392 = vmax.xlane.f32.xlu1 %v391_v60 }
 0x4d6   :  { %v393_v1 = vpop.xlane.xlu1 %392 }
 0x4d7   :  { %v394_v2 = vsub.f32 %v387_v58, %v393_v1 }
 0x4d9   :  { %v395_v3 = vmul.f32 1.442695, %v394_v2 }
 0x4db   :  { %4066 = vpow2.f32 %v395_v3 }
 0x4e5   :  { %v4067_v4 = vpop.eup %4066 }
 0x4e6   :  { %v397_v5 = vsel %vm228_vm2, %v4067_v4, 0.0 }
 0x4e7   :  { %398 = vadd.xlane.f32.xlu1 %v397_v5 }
 0x4f8   :  { %650 = vrot.lane.b32.xlu1 %v648_v6, %s4175_s27 }
 0x574   :  { %v399_v8 = vpop.xlane.xlu1 %398 }
 0x575   :  { %4068 = vrcp.f32 %v399_v8 }
 0x578   :  { %v651_v12 = vpop.permute.xlu1 %650 }
 0x57f   :  { %v4069_v9 = vpop.eup %4068 }
 0x580   :  { %v401_v10 = vmul.f32 %v4069_v9, %v4067_v4 }
 0x582   :  { %3709 = vmatmul.mubr.msk.f32.vlgmr.msra.gmra.mrb[6].mxu1 %vm228_vm2, %v401_v10 }
 0x583   :  { %3712 = vmatpush3.xpose.msk.msra.mxu1 %vm42_vm0, %v489_v11  ;;  %3713 = vmatprep.mubr.msk.f32.mxu1 %vm4176_vm1, %v4174_v7 }
 0x584   :  { %3721 = vmatprep.subr.mxu1 %v4174_v7 }
 0x586   :  { %3714 = vmatmul.mubr.msk.f32.vlgmr.msra.gmra.mrb[8].mxu1 %vm42_vm0, %v4303_v32 }
 0x587   :  { %3722 = vmatpush3.xpose.msk.msra.mxu1 %vm42_vm0, %v651_v12  ;;  %3723 = vmatprep.mubr.msk.f32.mxu1 %vm4176_vm1, %v4174_v7 }
 0x588   :  { %3731 = vmatprep.subr.mxu1 %v4174_v7 }
 0x58a   :  { %3724 = vmatmul.mubr.msk.f32.vlgmr.msra.gmra.mrb[10].mxu1 %vm42_vm0, %v4303_v32 }
 0x58b   :  { %3732 = vmatpush3.xpose.msk.msra.mxu1 %vm42_vm0, %v813_v13  ;;  %3733 = vmatprep.mubr.msk.f32.mxu1 %vm4176_vm1, %v4174_v7 }
 0x58c   :  { %3741 = vmatprep.subr.mxu1 %v4174_v7 }
 0x58e   :  { %3734 = vmatmul.mubr.msk.f32.vlgmr.msra.gmra.mrb[12].mxu1 %vm42_vm0, %v4311_v37 }
 0x58f   :  { %3742 = vmatpush3.xpose.msk.msra.mxu1 %vm42_vm0, %v978_v14  ;;  %3743 = vmatprep.mubr.msk.f32.mxu1 %vm4176_vm1, %v4174_v7 }
 0x590   :  { %3751 = vmatprep.subr.mxu1 %v4174_v7 }
 0x592   :  { %3744 = vmatmul.mubr.msk.f32.vlgmr.msra.gmra.mrb[14].mxu1 %vm42_vm0, %v4311_v37 }
 0x593   :  { %3752 = vmatpush3.xpose.msk.msra.mxu1 %vm42_vm0, %v1140_v15  ;;  %3753 = vmatprep.mubr.msk.f32.mxu1 %vm4176_vm1, %v4174_v7 }
 0x594   :  { %3761 = vmatprep.subr.mxu1 %v4174_v7 }
 0x596   :  { %3754 = vmatmul.mubr.msk.f32.vlgmr.msra.gmra.mrb[16].mxu1 %vm42_vm0, %v4311_v37 }
 0x597   :  { %3762 = vmatpush3.xpose.msk.msra.mxu1 %vm42_vm0, %v1302_v16  ;;  %3763 = vmatprep.mubr.msk.f32.mxu1 %vm4176_vm1, %v4174_v7 }
 0x59a   :  { %3764 = vmatmul.mubr.msk.f32.vlgmr.msra.gmra.mrb[18].mxu1 %vm42_vm0, %v4311_v37 }
 0x655   :  { %v471_v17 = vpop.f32.mrb[6].mxu1 }
 0x656   :  { %v475_v19 = vmul.f32 %v471_v17, %v4301_v31  ;;  %v3710_v21 = vpop.f32.mrb[7].mxu1 }
 0x658   :  { %v4408_v22 = vadd.f32 %v475_v19, %v313_v18 }
 0x659   :  { %v558_v23 = vpop.f32.mrb[8].mxu1 }
 0x65a   :  { %v3715_v24 = vpop.f32.mrb[9].mxu1  ;;  %v562_v25 = vsel %vm228_vm2, %v558_v23, -inf }
 0x65b   :  { %563 = vmax.xlane.f32.xlu1 %v562_v25 }
 0x65d   :  { %v720_v28 = vpop.f32.mrb[10].mxu1 }
 0x65e   :  { %v3725_v30 = vpop.f32.mrb[11].mxu1  ;;  %v724_v32 = vsel %vm228_vm2, %v720_v28, -inf }
 0x65f   :  { %725 = vmax.xlane.f32.xlu0 %v724_v32  ;;  %v139_v30 = vadd.f32 %v4299_v29, %v4357_v62 }
 0x661   :  { %v885_v33 = vpop.f32.mrb[12].mxu1 }
 0x662   :  { %v3735_v35 = vpop.f32.mrb[13].mxu1  ;;  %v889_v36 = vsel %vm228_vm2, %v885_v33, -inf }
 0x663   :  { %890 = vmax.xlane.f32.xlu0 %v889_v36 }
 0x665   :  { %v1047_v37 = vpop.f32.mrb[14].mxu1 }
 0x666   :  { %v3745_v38 = vpop.f32.mrb[15].mxu1  ;;  %v1051_v40 = vsel %vm228_vm2, %v1047_v37, -inf }
 0x667   :  { %1052 = vmax.xlane.f32.xlu1 %v1051_v40  ;;  %v1461_v40 = vld [vmem:[%s4861_s2] sm:$0xff] }
 0x669   :  { %v1209_v41 = vpop.f32.mrb[16].mxu1 }
 0x66a   :  { %v3755_v43 = vpop.f32.mrb[17].mxu1  ;;  %v1213_v44 = vsel %vm228_vm2, %v1209_v41, -inf }
 0x66b   :  { %1214 = vmax.xlane.f32.xlu0 %v1213_v44  ;;  %v1463_v44 = vld [vmem:[%s4861_s2 + $0x10] sm:$0xff] }
 0x66d   :  { %v1371_v45 = vpop.f32.mrb[18].mxu1 }
 0x66e   :  { %v3765_v46 = vpop.f32.mrb[19].mxu1  ;;  %v1375_v47 = vsel %vm228_vm2, %v1371_v45, -inf }
 0x66f   :  { %1376 = vmax.xlane.f32.xlu1 %v1375_v47  ;;  %v1465_v47 = vld [vmem:[%s4861_s2 + $0x20] sm:$0xff] }
 0x6e8   :  { %v564_v48 = vpop.xlane.xlu1 %563 }
 0x6e9   :  { %v565_v49 = vsub.f32 %v558_v23, %v564_v48  ;;  %v1466_v48 = vld [vmem:[%s4861_s2 + $0x28] sm:$0xff] }
 0x6eb   :  { %v566_v50 = vmul.f32 1.442695, %v565_v49  ;;  %v3967_v49 = vpack.c.bf16 %v1466_v48, %v1465_v47  ;;  %v1604_v48 = vld [vmem:[%s4860_s1 + $0xc0] sm:$0xff] }
 0x6ec   :  { %v726_v51 = vpop.xlane.xlu0 %725 }
 0x6ed   :  { %4070 = vpow2.f32 %v566_v50  ;;  %v727_v52 = vsub.f32 %v720_v28, %v726_v51  ;;  %v1467_v50 = vld [vmem:[%s4861_s2 + $0x30] sm:$0xff]  ;;  %v1468_v51 = vld [vmem:[%s4861_s2 + $0x38] sm:$0xff] }
 0x6ef   :  { %v728_v53 = vmul.f32 1.442695, %v727_v52  ;;  %v3971_v52 = vpack.c.bf16 %v1468_v51, %v1467_v50  ;;  %v1609_v51 = vld [vmem:[%s4860_s1 + $0xe8] sm:$0xff] }
 0x6f0   :  { %v891_v54 = vpop.xlane.xlu0 %890 }
 0x6f1   :  { %4072 = vpow2.f32 %v728_v53  ;;  %v892_v55 = vsub.f32 %v885_v33, %v891_v54 }
 0x6f3   :  { %v893_v56 = vmul.f32 1.442695, %v892_v55 }
 0x6f4   :  { %v1053_v57 = vpop.xlane.xlu1 %1052 }
 0x6f5   :  { %4074 = vpow2.f32 %v893_v56  ;;  %v1054_v58 = vsub.f32 %v1047_v37, %v1053_v57 }
 0x6f7   :  { %v4071_v59 = vpop.eup %4070  ;;  %v1055_v60 = vmul.f32 1.442695, %v1054_v58 }
 0x6f8   :  { %v1215_v61 = vpop.xlane.xlu0 %1214  ;;  %v568_v63 = vsel %vm228_vm2, %v4071_v59, 0.0 }
 0x6f9   :  { %4076 = vpow2.f32 %v1055_v60  ;;  %v1216_v0 = vsub.f32 %v1209_v41, %v1215_v61  ;;  %569 = vadd.xlane.f32.xlu0 %v568_v63  ;;  %v1462_v41 = vld [vmem:[%s4861_s2 + $0x8] sm:$0xff] }
 0x6fa   :  { %v3959_v43 = vpack.c.bf16 %v1462_v41, %v1461_v40  ;;  %v1600_v40 = vld [vmem:[%s4860_s1 + $0xa0] sm:$0xff]  ;;  %v1602_v41 = vld [vmem:[%s4860_s1 + $0xb0] sm:$0xff] }
 0x6fb   :  { %v4073_v1 = vpop.eup %4072  ;;  %v1217_v2 = vmul.f32 1.442695, %v1216_v0 }
 0x6fc   :  { %v1377_v3 = vpop.xlane.xlu1 %1376  ;;  %v730_v4 = vsel %vm228_vm2, %v4073_v1, 0.0  ;;  %3960 = vmatprep.subr.bf16.mxu1 %v3959_v43 }
 0x6fd   :  { %4078 = vpow2.f32 %v1217_v2  ;;  %v1378_v5 = vsub.f32 %v1371_v45, %v1377_v3  ;;  %731 = vadd.xlane.f32.xlu1 %v730_v4  ;;  %3962 = vmatpush3.bf16.msra.mxu1 %v3959_v43  ;;  %v1464_v45 = vld [vmem:[%s4861_s2 + $0x18] sm:$0xff] }
 0x6fe   :  { %v3963_v46 = vpack.c.bf16 %v1464_v45, %v1463_v44  ;;  %v1605_v44 = vld [vmem:[%s4860_s1 + $0xc8] sm:$0xff]  ;;  %v1607_v45 = vld [vmem:[%s4860_s1 + $0xd8] sm:$0xff] }
 0x6ff   :  { %v4075_v6 = vpop.eup %4074  ;;  %v1379_v8 = vmul.f32 1.442695, %v1378_v5  ;;  %v3983_v47 = vpack.c.bf16 %v1607_v45, %v1605_v44 }
 0x700   :  { %v895_v9 = vsel %vm228_vm2, %v4075_v6, 0.0  ;;  %3964 = vmatprep.subr.bf16.mxu1 %v3963_v46 }
 0x701   :  { %4080 = vpow2.f32 %v1379_v8  ;;  %896 = vadd.xlane.f32.xlu0 %v895_v9  ;;  %3966 = vmatpush3.bf16.msra.mxu1 %v3963_v46  ;;  %v3981_v46 = vpack.c.bf16 %v1602_v41, %v1600_v40 }
 0x702   :  { %3968 = vmatprep.subr.bf16.mxu1 %v3967_v49 }
 0x703   :  { %v4077_v10 = vpop.eup %4076 }
 0x704   :  { %v1057_v11 = vsel %vm228_vm2, %v4077_v10, 0.0 }
 0x705   :  { %1058 = vadd.xlane.f32.xlu1 %v1057_v11  ;;  %3970 = vmatpush3.bf16.msra.mxu1 %v3967_v49  ;;  %v1606_v49 = vld [vmem:[%s4860_s1 + $0xd0] sm:$0xff] }
 0x706   :  { %3972 = vmatprep.subr.bf16.mxu1 %v3971_v52  ;;  %v3985_v50 = vpack.c.bf16 %v1606_v49, %v1604_v48 }
 0x707   :  { %v4079_v12 = vpop.eup %4078 }
 0x708   :  { %v1219_v13 = vsel %vm228_vm2, %v4079_v12, 0.0 }
 0x709   :  { %1220 = vadd.xlane.f32.xlu0 %v1219_v13  ;;  %3974 = vmatpush3.bf16.msra.mxu1 %v3971_v52  ;;  %v1611_v52 = vld [vmem:[%s4860_s1 + $0xf8] sm:$0xff] }
 0x70a   :  { %3790 = vmatprep.subr.mxu1 %v4174_v7 }
 0x70b   :  { %v4081_v14 = vpop.eup %4080 }
 0x70c   :  { %v1381_v15 = vsel %vm228_vm2, %v4081_v14, 0.0 }
 0x70d   :  { %1382 = vadd.xlane.f32.xlu1 %v1381_v15 }
 0x71f   :  { %1470 = vrot.lane.b32.xlu0 %v4299_v29, %s4175_s27 }
 0x786   :  { %v570_v16 = vpop.xlane.xlu0 %569 }
 0x787   :  { %4082 = vrcp.f32 %v570_v16 }
 0x78a   :  { %v732_v17 = vpop.xlane.xlu1 %731 }
 0x78b   :  { %4084 = vrcp.f32 %v732_v17 }
 0x78e   :  { %v897_v18 = vpop.xlane.xlu0 %896 }
 0x78f   :  { %4086 = vrcp.f32 %v897_v18 }
 0x791   :  { %v4083_v19 = vpop.eup %4082 }
 0x792   :  { %v572_v21 = vmul.f32 %v4083_v19, %v4071_v59  ;;  %v1059_v23 = vpop.xlane.xlu1 %1058 }
 0x793   :  { %4088 = vrcp.f32 %v1059_v23 }
 0x794   :  { %3719 = vmatmul.mubr.msk.f32.vlgmr.msra.gmra.mrb[4].mxu0 %vm228_vm2, %v572_v21 }
 0x795   :  { %v4085_v24 = vpop.eup %4084  ;;  %3727 = vmatpush3.msra.mxu0 %v4306_v34  ;;  %3728 = vmatprep.mubr.msk.f32.mxu0 %vm4176_vm1, %v4174_v7 }
 0x796   :  { %v734_v25 = vmul.f32 %v4085_v24, %v4073_v1  ;;  %v1221_v28 = vpop.xlane.xlu0 %1220  ;;  %3736 = vmatprep.subr.mxu0 %v4174_v7 }
 0x797   :  { %4090 = vrcp.f32 %v1221_v28 }
 0x798   :  { %3729 = vmatmul.mubr.msk.f32.vlgmr.msra.gmra.mrb[6].mxu0 %vm228_vm2, %v734_v25 }
 0x799   :  { %v4087_v32 = vpop.eup %4086  ;;  %3737 = vmatpush3.msra.mxu0 %v139_v30  ;;  %3738 = vmatprep.mubr.msk.f32.mxu0 %vm4176_vm1, %v4174_v7 }
 0x79a   :  { %v899_v33 = vmul.f32 %v4087_v32, %v4075_v6  ;;  %v1383_v34 = vpop.xlane.xlu1 %1382  ;;  %3746 = vmatprep.subr.mxu0 %v4174_v7 }
 0x79b   :  { %4092 = vrcp.f32 %v1383_v34  ;;  %v1599_v34 = vld [vmem:[%s4860_s1 + $0x98] sm:$0xff] }
 0x79c   :  { %3739 = vmatmul.mubr.msk.f32.vlgmr.msra.gmra.mrb[8].mxu0 %vm228_vm2, %v899_v33  ;;  %v1597_v33 = vld [vmem:[%s4860_s1 + $0x88] sm:$0xff] }
 0x79d   :  { %v4089_v35 = vpop.eup %4088  ;;  %3747 = vmatpush3.msra.mxu0 %v139_v30  ;;  %3748 = vmatprep.mubr.msk.f32.mxu0 %vm4176_vm1, %v4174_v7 }
 0x79e   :  { %v1061_v29 = vmul.f32 %v4089_v35, %v4077_v10  ;;  %3756 = vmatprep.subr.mxu0 %v4174_v7  ;;  %v3975_v35 = vpack.c.bf16 %v1599_v34, %v1597_v33 }
 0x7a0   :  { %3749 = vmatmul.mubr.msk.f32.vlgmr.msra.gmra.mrb[10].mxu0 %vm228_vm2, %v1061_v29  ;;  %v1596_v29 = vld [vmem:[%s4860_s1 + $0x80] sm:$0xff] }
 0x7a1   :  { %v4091_v62 = vpop.eup %4090  ;;  %3757 = vmatpush3.msra.mxu0 %v139_v30  ;;  %3758 = vmatprep.mubr.msk.f32.mxu0 %vm4176_vm1, %v4174_v7 }
 0x7a2   :  { %v1223_v36 = vmul.f32 %v4091_v62, %v4079_v12  ;;  %3766 = vmatprep.subr.mxu0 %v4174_v7  ;;  %v1598_v62 = vld [vmem:[%s4860_s1 + $0x90] sm:$0xff] }
 0x7a4   :  { %3759 = vmatmul.mubr.msk.f32.vlgmr.msra.gmra.mrb[12].mxu0 %vm228_vm2, %v1223_v36  ;;  %v1601_v36 = vld [vmem:[%s4860_s1 + $0xa8] sm:$0xff] }
 0x7a5   :  { %v4093_v37 = vpop.eup %4092  ;;  %3767 = vmatpush3.msra.mxu0 %v139_v30  ;;  %3768 = vmatprep.mubr.msk.f32.mxu0 %vm4176_vm1, %v4174_v7 }
 0x7a6   :  { %v1385_v38 = vmul.f32 %v4093_v37, %v4081_v14  ;;  %v3977_v37 = vpack.c.bf16 %v1598_v62, %v1596_v29  ;;  %3976 = vmatprep.subr.bf16.mxu0 %v3975_v35 }
 0x7a8   :  { %3769 = vmatmul.mubr.msk.f32.vlgmr.msra.gmra.mrb[14].mxu0 %vm228_vm2, %v1385_v38  ;;  %v1603_v38 = vld [vmem:[%s4860_s1 + $0xb8] sm:$0xff] }
 0x7a9   :  { %1682 = vmatprep.mubr.f32.mxu0 %v4174_v7  ;;  %v3979_v43 = vpack.c.bf16 %v1603_v38, %v1601_v36  ;;  %3978 = vmatpush1.bf16.msra.mxu0 %v3977_v37 }
 0x7ab   :  { %3980 = vmatprep.subr.bf16.mxu0 %v3979_v43 }
 0x7ad   :  { %3982 = vmatpush1.bf16.msra.mxu0 %v3981_v46 }
 0x7ae   :  { %3984 = vmatprep.subr.bf16.mxu0 %v3983_v47 }
 0x7b1   :  { %3986 = vmatpush1.bf16.msra.mxu0 %v3985_v50 }
 0x867   :  { %v642_v53 = vpop.f32.mrb[4].mxu0 }
 0x868   :  { %v646_v54 = vmul.f32 %v4321_v39, %v642_v53  ;;  %v3720_v55 = vpop.f32.mrb[5].mxu0  ;;  %v3987_v53 = vpack.c.bf16 %v1611_v52, %v1609_v51 }
 0x869   :  { %v1610_v55 = vld [vmem:[%s4860_s1 + $0xf0] sm:$0xff] }
 0x86a   :  { %v647_v56 = vadd.f32 %v646_v54, %v4408_v22  ;;  %v1608_v54 = vld [vmem:[%s4860_s1 + $0xe0] sm:$0xff]  ;;  %3988 = vmatprep.subr.bf16.mxu0 %v3987_v53 }
 0x86b   :  { %v804_v57 = vpop.f32.mrb[6].mxu0 }
 0x86c   :  { %v808_v58 = vmul.f32 %v804_v57, %v4333_v42  ;;  %v3730_v59 = vpop.f32.mrb[7].mxu0  ;;  %v4546_v57 = vld [vmem:[%s4864_s5 + $0xc] ss:$0 sm:$0xff] }
 0x86d   :  { %1715 = vrot.lane.b32.xlu0 %v4546_v57, %s4175_s27 }
 0x86e   :  { %v809_v60 = vadd.f32 %v808_v58, %v647_v56  ;;  %v3989_v56 = vpack.c.bf16 %v1610_v55, %v1608_v54  ;;  %v4553_v58 = vld [vmem:[%s4864_s5 + $0xd] ss:$0 sm:$0xff] }
 0x86f   :  { %v969_v61 = vpop.f32.mrb[8].mxu0 }
 0x870   :  { %v3740_v63 = vpop.f32.mrb[9].mxu0  ;;  %3787 = vmatprep.mubr.msk.f32.mxu1 %vm42_vm0, %v809_v60  ;;  %v973_v1 = vmul.f32 %v4263_v20, %v969_v61  ;;  %v1471_v20 = vpop.permute.xlu0 %1470  ;;  %3990 = vmatpush1.bf16.msra.mxu0 %v3989_v56 }
 0x871   :  { %3800 = vmatprep.subr.mxu0 %v4174_v7  ;;  %2051 = vrot.lane.b32.xlu0 %v4553_v58, %s4175_s27 }
 0x873   :  { %v1131_v0 = vpop.f32.mrb[10].mxu0 }
 0x874   :  { %v1135_v2 = vmul.f32 %v1131_v0, %v4301_v31  ;;  %v3750_v3 = vpop.f32.mrb[11].mxu0 }
 0x876   :  { %v1136_v4 = vadd.f32 %v1135_v2, %v973_v1 }
 0x877   :  { %v1293_v5 = vpop.f32.mrb[12].mxu0 }
 0x878   :  { %v1297_v6 = vmul.f32 %v4321_v39, %v1293_v5  ;;  %v3760_v22 = vpop.f32.mrb[13].mxu0 }
 0x87a   :  { %v1298_v8 = vadd.f32 %v1297_v6, %v1136_v4 }
 0x87b   :  { %v1455_v9 = vpop.f32.mrb[14].mxu0 }
 0x87c   :  { %v1459_v10 = vmul.f32 %v1455_v9, %v4333_v42  ;;  %v3770_v11 = vpop.f32.mrb[15].mxu0 }
 0x87e   :  { %v1460_v12 = vadd.f32 %v1459_v10, %v1298_v8 }
 0x880   :  { %3788 = vmatmul.mubr.msk.f32.vlgmr.msra.gmra.mrb[20].mxu1 %vm42_vm0, %v1460_v12  ;;  %v3542_v12 = vld [vmem:[%s4864_s5 + $0x2] ss:$0 sm:$0xff] }
 0x881   :  { %3792 = vmatprep.mubr.msk.f32.mxu1 %vm4176_vm1, %v4174_v7 }
 0x8df   :  { %v4568_v11 = vpop.permute.xlu0 %1715 }
 0x953   :  { %v3789_v13 = vpop.f32.mrb[20].mxu1 }
 0x954   :  { %v1545_v31 = vpop.f32.mrb[21].mxu1  ;;  %v1551_v14 = vadd.f32 %v3789_v13, %v1471_v20  ;;  %v4573_v13 = vpop.permute.xlu0 %2051 }
 0x955   :  { %v1546_v15 = vadd.f32 %v1545_v31, %v1471_v20 }
 0x956   :  { %v1555_v17 = vadd.f32 %v1551_v14, %v4285_v27  ;;  %v3539_v27 = vld [vmem:[%s4864_s5 + $0x6] ss:$0 sm:$0xff] }
 0x957   :  { %v1554_v16 = vadd.f32 %v1546_v15, %v4276_v26 }
 0x958   :  { %v1560_v42 = vsel %vm42_vm0, %v1555_v17, 0.0 }
 0x959   :  { %v1557_v39 = vsel %vm42_vm0, %v1554_v16, 0.0 }
 0x95a   :  { %1558 = vadd.xlane.f32.xlu1 %v1557_v39 }
 0x95e   :  { %1561 = vadd.xlane.f32.xlu1 %v1560_v42 }
 0x9e7   :  { %v1559_v18 = vpop.xlane.xlu1 %1558 }
 0x9e8   :  { %v1564_v19 = vmul.f32 0.015625, %v1559_v18 }
 0x9ea   :  { %v1566_v24 = vsub.f32 %v1554_v16, %v1564_v19 }
 0x9eb   :  { %v1562_v21 = vpop.xlane.xlu1 %1561 }
 0x9ec   :  { %v1565_v23 = vmul.f32 0.015625, %v1562_v21  ;;  %v1568_v32 = vmul.f32 %v1566_v24, %v1566_v24 }
 0x9ee   :  { %v1567_v25 = vsub.f32 %v1555_v17, %v1565_v23  ;;  %v1570_v26 = vsel %vm42_vm0, %v1568_v32, 0.0 }
 0x9f0   :  { %v1569_v28 = vmul.f32 %v1567_v25, %v1567_v25 }
 0x9f2   :  { %v1573_v30 = vsel %vm42_vm0, %v1569_v28, 0.0  ;;  %v4596_v28 = vld [vmem:[%s4864_s5 + $0x3] ss:$0 sm:$0xff] }
 0x9f3   :  { %1574 = vadd.xlane.f32.xlu1 %v1573_v30 }
 0x9f7   :  { %1571 = vadd.xlane.f32.xlu1 %v1570_v26 }
 0xa08   :  { %1591 = vrot.lane.b32.xlu1 %v3539_v27, %s4175_s27 }
 0xa80   :  { %v1575_v59 = vpop.xlane.xlu1 %1574 }
 0xa81   :  { %v1577_v60 = vmul.f32 0.015625, %v1575_v59 }
 0xa83   :  { %v1579_v61 = vadd.f32 1e-05, %v1577_v60 }
 0xa84   :  { %v1572_v63 = vpop.xlane.xlu1 %1571 }
 0xa85   :  { %v1576_v0 = vmul.f32 0.015625, %v1572_v63  ;;  %4094 = vrsqrt.f32 %v1579_v61 }
 0xa87   :  { %v1578_v1 = vadd.f32 1e-05, %v1576_v0 }
 0xa88   :  { %v1592_v22 = vpop.permute.xlu1 %1591 }
 0xa89   :  { %4096 = vrsqrt.f32 %v1578_v1 }
 0xa8f   :  { %v4095_v2 = vpop.eup %4094 }
 0xa90   :  { %v1583_v5 = vmul.f32 %v4095_v2, %v1567_v25 }
 0xa92   :  { %v1589_v8 = vmul.f32 %v3539_v27, %v1583_v5 }
 0xa93   :  { %v4097_v3 = vpop.eup %4096 }
 0xa94   :  { %v1582_v4 = vmul.f32 %v4097_v3, %v1566_v24  ;;  %v4562_v10 = vadd.f32 %v1592_v22, %v1589_v8 }
 0xa96   :  { %v1588_v6 = vmul.f32 %v3539_v27, %v1582_v4 }
 0xa98   :  { %v4557_v9 = vadd.f32 %v1592_v22, %v1588_v6 }
 0xa9a   :  { %3540 = vmatmul.mubr.msk.f32.vlgmr.msra.gmra.mrb[16].mxu0 %vm42_vm0, %v4557_v9 }
 0xa9b   :  { %1688 = vmatprep.mubr.f32.mxu0 %v4174_v7 }
 0xa9e   :  { %3541 = vmatmul.mubr.msk.f32.gmra.mrb[18].mxu0 %vm42_vm0, %v4562_v10 }
 0xa9f   :  { %3802 = vmatprep.mubr.msk.f32.mxu0 %vm4176_vm1, %v4174_v7 }
 0xb6d   :  { %v1684_v20 = vpop.f32.mrb[16].mxu0 }
 0xb6e   :  { %v1700_v31 = vadd.f32 %v3542_v12, %v1684_v20  ;;  %v1686_v14 = vpop.f32.mrb[17].mxu0 }
 0xb6f   :  { %v4601_v32 = vadd.f32 %v4596_v28, %v1686_v14 }
 0xb70   :  { %v2054_v15 = vmul.f32 %v4573_v13, %v1700_v31  ;;  %v1718_v16 = vmul.f32 %v4568_v11, %v1700_v31  ;;  %v1883_v18 = vmul.f32 %v4546_v57, %v1700_v31  ;;  %v2216_v21 = vmul.f32 %v4553_v58, %v1700_v31 }
 0xb71   :  { %v1690_v39 = vpop.f32.mrb[18].mxu0 }
 0xb72   :  { %v1701_v17 = vadd.f32 %v3542_v12, %v1690_v39  ;;  %2056 = vrot.lane.b32.xlu1 %v2054_v15, %s4175_s27  ;;  %1720 = vrot.lane.b32.xlu0 %v1718_v16, %s4175_s27  ;;  %v4579_v42 = vpop.f32.mrb[19].mxu0 }
 0xb74   :  { %v2378_v19 = vmul.f32 %v4568_v11, %v1701_v17  ;;  %v2705_v23 = vmul.f32 %v4573_v13, %v1701_v17  ;;  %v2543_v24 = vmul.f32 %v4546_v57, %v1701_v17  ;;  %v2867_v25 = vmul.f32 %v4553_v58, %v1701_v17 }
 0xb76   :  { %1885 = vrot.lane.b32.xlu0 %v1883_v18, %s4175_s27  ;;  %2380 = vrot.lane.b32.xlu1 %v2378_v19, %s4175_s27 }
 0xb7a   :  { %2218 = vrot.lane.b32.xlu0 %v2216_v21, %s4175_s27  ;;  %2707 = vrot.lane.b32.xlu1 %v2705_v23, %s4175_s27 }
 0xb7e   :  { %2545 = vrot.lane.b32.xlu0 %v2543_v24, %s4175_s27 }
 0xb82   :  { %2869 = vrot.lane.b32.xlu0 %v2867_v25, %s4175_s27 }
 0xbe4   :  { %v1721_v30 = vpop.permute.xlu0 %1720  ;;  %v2057_v27 = vpop.permute.xlu1 %2056 }
 0xbe5   :  { %3791 = vmatpush3.xpose.msk.msra.mxu1 %vm42_vm0, %v1721_v30 }
 0xbe6   :  { %3795 = vmatprep.subr.mxu1 %v4174_v7 }
 0xbe8   :  { %3793 = vmatmul.mubr.msk.f32.vlgmr.msra.gmra.mrb[22].mxu1 %vm42_vm0, %v1700_v31  ;;  %v1886_v26 = vpop.permute.xlu0 %1885  ;;  %v2381_v34 = vpop.permute.xlu1 %2380 }
 0xbe9   :  { %3796 = vmatpush3.msra.mxu1 %v4601_v32  ;;  %3801 = vmatpush3.xpose.msk.msra.mxu0 %vm42_vm0, %v1886_v26 }
 0xbea   :  { %3810 = vmatprep.subr.mxu0 %v4174_v7  ;;  %3797 = vmatprep.mubr.msk.f32.mxu1 %vm4176_vm1, %v4174_v7 }
 0xbeb   :  { %3805 = vmatprep.subr.mxu1 %v4174_v7 }
 0xbec   :  { %3803 = vmatmul.mubr.msk.f32.vlgmr.msra.gmra.mrb[20].mxu0 %vm42_vm0, %v1700_v31  ;;  %v2219_v33 = vpop.permute.xlu0 %2218  ;;  %v2708_v29 = vpop.permute.xlu1 %2707 }
 0xbed   :  { %3811 = vmatpush3.xpose.msk.msra.mxu0 %vm42_vm0, %v2057_v27  ;;  %3812 = vmatprep.mubr.msk.f32.mxu0 %vm4176_vm1, %v4174_v7 }
 0xbee   :  { %3820 = vmatprep.subr.mxu0 %v4174_v7 }
 0xbf0   :  { %3813 = vmatmul.mubr.msk.f32.vlgmr.msra.gmra.mrb[22].mxu0 %vm42_vm0, %v1700_v31  ;;  %v2546_v35 = vpop.permute.xlu0 %2545 }
 0xbf1   :  { %3821 = vmatpush3.xpose.msk.msra.mxu0 %vm42_vm0, %v2219_v33  ;;  %3822 = vmatprep.mubr.msk.f32.mxu0 %vm4176_vm1, %v4174_v7 }
 0xbf2   :  { %3830 = vmatprep.subr.mxu0 %v4174_v7 }
 0xbf4   :  { %3823 = vmatmul.mubr.msk.f32.vlgmr.msra.gmra.mrb[24].mxu0 %vm42_vm0, %v1700_v31  ;;  %v2870_v62 = vpop.permute.xlu0 %2869 }
 0xbf5   :  { %3831 = vmatpush3.xpose.msk.msra.mxu0 %vm42_vm0, %v2381_v34  ;;  %3832 = vmatprep.mubr.msk.f32.mxu0 %vm4176_vm1, %v4174_v7 }
 0xbf6   :  { %3840 = vmatprep.subr.mxu0 %v4174_v7 }
 0xbf8   :  { %3833 = vmatmul.mubr.msk.f32.vlgmr.msra.gmra.mrb[26].mxu0 %vm42_vm0, %v1701_v17 }
 0xbf9   :  { %3841 = vmatpush3.xpose.msk.msra.mxu0 %vm42_vm0, %v2546_v35  ;;  %3842 = vmatprep.mubr.msk.f32.mxu0 %vm4176_vm1, %v4174_v7 }
 0xbfa   :  { %3850 = vmatprep.subr.mxu0 %v4174_v7 }
 0xbfc   :  { %3843 = vmatmul.mubr.msk.f32.vlgmr.msra.gmra.mrb[28].mxu0 %vm42_vm0, %v1701_v17 }
 0xbfd   :  { %3851 = vmatpush3.xpose.msk.msra.mxu0 %vm42_vm0, %v2708_v29  ;;  %3852 = vmatprep.mubr.msk.f32.mxu0 %vm4176_vm1, %v4174_v7 }
 0xbfe   :  { %3860 = vmatprep.subr.mxu0 %v4174_v7 }
 0xc00   :  { %3853 = vmatmul.mubr.msk.f32.vlgmr.msra.gmra.mrb[30].mxu0 %vm42_vm0, %v1701_v17 }
 0xc01   :  { %3861 = vmatpush3.xpose.msk.msra.mxu0 %vm42_vm0, %v2870_v62  ;;  %3862 = vmatprep.mubr.msk.f32.mxu0 %vm4176_vm1, %v4174_v7 }
 0xc04   :  { %3863 = vmatmul.mubr.msk.f32.vlgmr.msra.gmra.mrb[32].mxu0 %vm42_vm0, %v1701_v17 }
 0xcbb   :  { %v1793_v36 = vpop.f32.mrb[22].mxu1 }
 0xcbc   :  { %v3794_v37 = vpop.f32.mrb[23].mxu1  ;;  %v1797_v38 = vsel %vm228_vm2, %v1793_v36, -inf }
 0xcbd   :  { %1798 = vmax.xlane.f32.xlu1 %v1797_v38 }
 0xcbf   :  { %v1955_v40 = vpop.f32.mrb[20].mxu0 }
 0xcc0   :  { %v3804_v41 = vpop.f32.mrb[21].mxu0  ;;  %v1959_v43 = vsel %vm228_vm2, %v1955_v40, -inf }
 0xcc1   :  { %1960 = vmax.xlane.f32.xlu0 %v1959_v43 }
 0xcc3   :  { %v2126_v44 = vpop.f32.mrb[22].mxu0 }
 0xcc4   :  { %v3814_v45 = vpop.f32.mrb[23].mxu0  ;;  %v2130_v46 = vsel %vm228_vm2, %v2126_v44, -inf }
 0xcc5   :  { %2131 = vmax.xlane.f32.xlu0 %v2130_v46 }
 0xcc7   :  { %v2288_v47 = vpop.f32.mrb[24].mxu0 }
 0xcc8   :  { %v3824_v48 = vpop.f32.mrb[25].mxu0  ;;  %v2292_v49 = vsel %vm228_vm2, %v2288_v47, -inf }
 0xcc9   :  { %2293 = vmax.xlane.f32.xlu1 %v2292_v49 }
 0xccb   :  { %v2453_v50 = vpop.f32.mrb[26].mxu0 }
 0xccc   :  { %v3834_v51 = vpop.f32.mrb[27].mxu0  ;;  %v2457_v52 = vsel %vm228_vm2, %v2453_v50, -inf }
 0xccd   :  { %2458 = vmax.xlane.f32.xlu0 %v2457_v52 }
 0xccf   :  { %v2615_v53 = vpop.f32.mrb[28].mxu0 }
 0xcd0   :  { %v3844_v54 = vpop.f32.mrb[29].mxu0  ;;  %v2619_v55 = vsel %vm228_vm2, %v2615_v53, -inf }
 0xcd1   :  { %2620 = vmax.xlane.f32.xlu1 %v2619_v55 }
 0xcd3   :  { %v2777_v56 = vpop.f32.mrb[30].mxu0 }
 0xcd4   :  { %v3854_v59 = vpop.f32.mrb[31].mxu0  ;;  %v2781_v60 = vsel %vm228_vm2, %v2777_v56, -inf }
 0xcd5   :  { %2782 = vmax.xlane.f32.xlu0 %v2781_v60 }
 0xcd7   :  { %v2939_v61 = vpop.f32.mrb[32].mxu0 }
 0xcd8   :  { %v3864_v63 = vpop.f32.mrb[33].mxu0  ;;  %v2943_v0 = vsel %vm228_vm2, %v2939_v61, -inf }
 0xcd9   :  { %2944 = vmax.xlane.f32.xlu1 %v2943_v0 }
 0xd4a   :  { %v1799_v1 = vpop.xlane.xlu1 %1798 }
 0xd4b   :  { %v1800_v2 = vsub.f32 %v1793_v36, %v1799_v1 }
 0xd4d   :  { %v1801_v3 = vmul.f32 1.442695, %v1800_v2  ;;  %v1708_v2 = vadd.f32 %v4596_v28, %v4579_v42 }
 0xd4e   :  { %v1961_v4 = vpop.xlane.xlu0 %1960 }
 0xd4f   :  { %4098 = vpow2.f32 %v1801_v3  ;;  %v1962_v5 = vsub.f32 %v1955_v40, %v1961_v4 }
 0xd51   :  { %v1963_v6 = vmul.f32 1.442695, %v1962_v5 }
 0xd52   :  { %v2132_v22 = vpop.xlane.xlu0 %2131 }
 0xd53   :  { %4100 = vpow2.f32 %v1963_v6  ;;  %v2133_v8 = vsub.f32 %v2126_v44, %v2132_v22 }
 0xd55   :  { %v2134_v12 = vmul.f32 1.442695, %v2133_v8 }
 0xd56   :  { %v2294_v20 = vpop.xlane.xlu1 %2293 }
 0xd57   :  { %4102 = vpow2.f32 %v2134_v12  ;;  %v2295_v31 = vsub.f32 %v2288_v47, %v2294_v20  ;;  %v3029_v12 = vld [vmem:[%s4861_s2 + $0x40] sm:$0xff]  ;;  %v3030_v20 = vld [vmem:[%s4861_s2 + $0x48] sm:$0xff] }
 0xd59   :  { %v4099_v14 = vpop.eup %4098  ;;  %v2296_v15 = vmul.f32 1.442695, %v2295_v31  ;;  %v3991_v31 = vpack.c.bf16 %v3030_v20, %v3029_v12  ;;  %v3165_v12 = vld [vmem:[%s4862_s3 + $0x10] sm:$0xff] }
 0xd5a   :  { %v2459_v16 = vpop.xlane.xlu0 %2458  ;;  %v1803_v39 = vsel %vm228_vm2, %v4099_v14, 0.0 }
 0xd5b   :  { %4104 = vpow2.f32 %v2296_v15  ;;  %v2460_v17 = vsub.f32 %v2453_v50, %v2459_v16  ;;  %1804 = vadd.xlane.f32.xlu0 %v1803_v39  ;;  %v3033_v16 = vld [vmem:[%s4861_s2 + $0x60] sm:$0xff]  ;;  %v3034_v39 = vld [vmem:[%s4861_s2 + $0x68] sm:$0xff] }
 0xd5d   :  { %v4101_v18 = vpop.eup %4100  ;;  %v2461_v19 = vmul.f32 1.442695, %v2460_v17  ;;  %v3999_v17 = vpack.c.bf16 %v3034_v39, %v3033_v16  ;;  %v3169_v39 = vld [vmem:[%s4862_s3 + $0x30] sm:$0xff] }
 0xd5e   :  { %v2621_v21 = vpop.xlane.xlu1 %2620  ;;  %v1965_v23 = vsel %vm228_vm2, %v4101_v18, 0.0 }
 0xd5f   :  { %4106 = vpow2.f32 %v2461_v19  ;;  %v2622_v24 = vsub.f32 %v2615_v53, %v2621_v21  ;;  %1966 = vadd.xlane.f32.xlu1 %v1965_v23  ;;  %v3036_v19 = vld [vmem:[%s4861_s2 + $0x78] sm:$0xff] }
 0xd61   :  { %v4103_v25 = vpop.eup %4102  ;;  %v2623_v30 = vmul.f32 1.442695, %v2622_v24 }
 0xd62   :  { %v2783_v26 = vpop.xlane.xlu0 %2782  ;;  %v2136_v27 = vsel %vm228_vm2, %v4103_v25, 0.0 }
 0xd63   :  { %4108 = vpow2.f32 %v2623_v30  ;;  %v2784_v33 = vsub.f32 %v2777_v56, %v2783_v26  ;;  %2137 = vadd.xlane.f32.xlu0 %v2136_v27 }
 0xd65   :  { %v4105_v34 = vpop.eup %4104  ;;  %v2785_v35 = vmul.f32 1.442695, %v2784_v33 }
 0xd66   :  { %v2945_v29 = vpop.xlane.xlu1 %2944  ;;  %v2298_v62 = vsel %vm228_vm2, %v4105_v34, 0.0 }
 0xd67   :  { %4110 = vpow2.f32 %v2785_v35  ;;  %v2946_v36 = vsub.f32 %v2939_v61, %v2945_v29  ;;  %2299 = vadd.xlane.f32.xlu1 %v2298_v62 }
 0xd69   :  { %v4107_v37 = vpop.eup %4106  ;;  %v2947_v38 = vmul.f32 1.442695, %v2946_v36 }
 0xd6a   :  { %v2463_v40 = vsel %vm228_vm2, %v4107_v37, 0.0 }
 0xd6b   :  { %4112 = vpow2.f32 %v2947_v38  ;;  %2464 = vadd.xlane.f32.xlu0 %v2463_v40 }
 0xd6d   :  { %v4109_v41 = vpop.eup %4108 }
 0xd6e   :  { %v2625_v43 = vsel %vm228_vm2, %v4109_v41, 0.0 }
 0xd6f   :  { %2626 = vadd.xlane.f32.xlu1 %v2625_v43 }
 0xd71   :  { %v4111_v44 = vpop.eup %4110 }
 0xd72   :  { %v2787_v45 = vsel %vm228_vm2, %v4111_v44, 0.0 }
 0xd73   :  { %2788 = vadd.xlane.f32.xlu0 %v2787_v45 }
 0xd75   :  { %v4655_v46 = vpop.eup %4112 }
 0xd76   :  { %v2949_v47 = vsel %vm228_vm2, %v4655_v46, 0.0 }
 0xd77   :  { %2950 = vadd.xlane.f32.xlu1 %v2949_v47 }
 0xd89   :  { %3038 = vrot.lane.b32.xlu0 %v4596_v28, %s4175_s27 }
 0xde8   :  { %v1805_v48 = vpop.xlane.xlu0 %1804 }
 0xde9   :  { %4114 = vrcp.f32 %v1805_v48 }
 0xdec   :  { %v1967_v49 = vpop.xlane.xlu1 %1966 }
 0xded   :  { %4116 = vrcp.f32 %v1967_v49 }
 0xdf0   :  { %v2138_v50 = vpop.xlane.xlu0 %2137 }
 0xdf1   :  { %4118 = vrcp.f32 %v2138_v50 }
 0xdf3   :  { %v4115_v51 = vpop.eup %4114 }
 0xdf4   :  { %v1807_v52 = vmul.f32 %v4115_v51, %v4099_v14  ;;  %v2300_v53 = vpop.xlane.xlu1 %2299  ;;  %v3031_v14 = vld [vmem:[%s4861_s2 + $0x50] sm:$0xff] }
 0xdf5   :  { %4120 = vrcp.f32 %v2300_v53 }
 0xdf6   :  { %3798 = vmatmul.mubr.msk.f32.vlgmr.msra.gmra.mrb[24].mxu1 %vm228_vm2, %v1807_v52 }
 0xdf7   :  { %v4117_v54 = vpop.eup %4116  ;;  %3806 = vmatpush3.msra.mxu1 %v4601_v32  ;;  %3807 = vmatprep.mubr.msk.f32.mxu1 %vm4176_vm1, %v4174_v7 }
 0xdf8   :  { %v1969_v55 = vmul.f32 %v4117_v54, %v4101_v18  ;;  %v2465_v56 = vpop.xlane.xlu0 %2464  ;;  %3815 = vmatprep.subr.mxu1 %v4174_v7  ;;  %v3035_v18 = vld [vmem:[%s4861_s2 + $0x70] sm:$0xff] }
 0xdf9   :  { %4122 = vrcp.f32 %v2465_v56  ;;  %v4003_v21 = vpack.c.bf16 %v3036_v19, %v3035_v18 }
 0xdfa   :  { %3808 = vmatmul.mubr.msk.f32.vlgmr.msra.gmra.mrb[26].mxu1 %vm228_vm2, %v1969_v55 }
 0xdfb   :  { %v4119_v59 = vpop.eup %4118  ;;  %3816 = vmatpush3.msra.mxu1 %v4601_v32  ;;  %3817 = vmatprep.mubr.msk.f32.mxu1 %vm4176_vm1, %v4174_v7 }
 0xdfc   :  { %v2140_v60 = vmul.f32 %v4119_v59, %v4103_v25  ;;  %v2627_v61 = vpop.xlane.xlu1 %2626  ;;  %3825 = vmatprep.subr.mxu1 %v4174_v7 }
 0xdfd   :  { %4124 = vrcp.f32 %v2627_v61 }
 0xdfe   :  { %3818 = vmatmul.mubr.msk.f32.vlgmr.msra.gmra.mrb[28].mxu1 %vm228_vm2, %v2140_v60 }
 0xdff   :  { %v4121_v63 = vpop.eup %4120  ;;  %3826 = vmatpush3.msra.mxu1 %v4601_v32  ;;  %3827 = vmatprep.mubr.msk.f32.mxu1 %vm4176_vm1, %v4174_v7 }
 0xe00   :  { %v2302_v0 = vmul.f32 %v4121_v63, %v4105_v34  ;;  %v2789_v1 = vpop.xlane.xlu0 %2788  ;;  %3835 = vmatprep.subr.mxu1 %v4174_v7 }
 0xe01   :  { %4126 = vrcp.f32 %v2789_v1 }
 0xe02   :  { %3828 = vmatmul.mubr.msk.f32.vlgmr.msra.gmra.mrb[30].mxu1 %vm228_vm2, %v2302_v0 }
 0xe03   :  { %v4123_v3 = vpop.eup %4122  ;;  %3836 = vmatpush3.msra.mxu1 %v1708_v2  ;;  %3837 = vmatprep.mubr.msk.f32.mxu1 %vm4176_vm1, %v4174_v7 }
 0xe04   :  { %v2467_v4 = vmul.f32 %v4123_v3, %v4107_v37  ;;  %v2951_v32 = vpop.xlane.xlu1 %2950  ;;  %3845 = vmatprep.subr.mxu1 %v4174_v7  ;;  %v3039_v59 = vpop.permute.xlu0 %3038 }
 0xe05   :  { %4128 = vrcp.f32 %v2951_v32 }
 0xe06   :  { %3838 = vmatmul.mubr.msk.f32.vlgmr.msra.gmra.mrb[32].mxu1 %vm228_vm2, %v2467_v4 }
 0xe07   :  { %v4125_v5 = vpop.eup %4124  ;;  %3846 = vmatpush3.msra.mxu1 %v1708_v2  ;;  %3847 = vmatprep.mubr.msk.f32.mxu1 %vm4176_vm1, %v4174_v7 }
 0xe08   :  { %v2629_v42 = vmul.f32 %v4125_v5, %v4109_v41  ;;  %3855 = vmatprep.subr.mxu1 %v4174_v7 }
 0xe0a   :  { %3848 = vmatmul.mubr.msk.f32.vlgmr.msra.gmra.mrb[34].mxu1 %vm228_vm2, %v2629_v42 }
 0xe0b   :  { %v4127_v28 = vpop.eup %4126  ;;  %3856 = vmatpush3.msra.mxu1 %v1708_v2  ;;  %3857 = vmatprep.mubr.msk.f32.mxu1 %vm4176_vm1, %v4174_v7 }
 0xe0c   :  { %v2791_v6 = vmul.f32 %v4127_v28, %v4111_v44  ;;  %3865 = vmatprep.subr.mxu1 %v4174_v7 }
 0xe0e   :  { %3858 = vmatmul.mubr.msk.f32.vlgmr.msra.gmra.mrb[36].mxu1 %vm228_vm2, %v2791_v6 }
 0xe0f   :  { %v4129_v22 = vpop.eup %4128  ;;  %3866 = vmatpush3.msra.mxu1 %v1708_v2  ;;  %3867 = vmatprep.mubr.msk.f32.mxu1 %vm4176_vm1, %v4174_v7  ;;  %v3032_v7 = vld [vmem:[%s4861_s2 + $0x58] sm:$0xff] }
 0xe10   :  { %v2953_v8 = vmul.f32 %v4129_v22, %v4655_v46  ;;  %3992 = vmatprep.subr.bf16.mxu1 %v3991_v31  ;;  %v3995_v15 = vpack.c.bf16 %v3032_v7, %v3031_v14  ;;  %v3163_v22 = vld [vmem:[%s4862_s3] sm:$0xff] }
 0xe11   :  { %v3167_v7 = vld [vmem:[%s4862_s3 + $0x20] sm:$0xff] }
 0xe12   :  { %3868 = vmatmul.mubr.msk.f32.vlgmr.msra.gmra.mrb[38].mxu1 %vm228_vm2, %v2953_v8  ;;  %v3164_v8 = vld [vmem:[%s4862_s3 + $0x8] sm:$0xff] }
 0xe13   :  { %3994 = vmatpush3.bf16.msra.mxu1 %v3991_v31  ;;  %v4007_v20 = vpack.c.bf16 %v3164_v8, %v3163_v22  ;;  %v3166_v31 = vld [vmem:[%s4862_s3 + $0x18] sm:$0xff] }
 0xe14   :  { %3996 = vmatprep.subr.bf16.mxu1 %v3995_v15  ;;  %v4011_v14 = vpack.c.bf16 %v3166_v31, %v3165_v12 }
 0xe17   :  { %3998 = vmatpush3.bf16.msra.mxu1 %v3995_v15  ;;  %v3168_v15 = vld [vmem:[%s4862_s3 + $0x28] sm:$0xff] }
 0xe18   :  { %4000 = vmatprep.subr.bf16.mxu1 %v3999_v17  ;;  %v4015_v16 = vpack.c.bf16 %v3168_v15, %v3167_v7 }
 0xe1b   :  { %4002 = vmatpush3.bf16.msra.mxu1 %v3999_v17  ;;  %v3170_v17 = vld [vmem:[%s4862_s3 + $0x38] sm:$0xff] }
 0xe1c   :  { %4004 = vmatprep.subr.bf16.mxu1 %v4003_v21  ;;  %v4019_v18 = vpack.c.bf16 %v3170_v17, %v3169_v39 }
 0xe1f   :  { %4006 = vmatpush3.bf16.msra.mxu1 %v4003_v21 }
 0xe20   :  { %4008 = vmatprep.subr.bf16.mxu1 %v4007_v20 }
 0xec9   :  { %v1877_v23 = vpop.f32.mrb[24].mxu1 }
 0xeca   :  { %v3799_v24 = vpop.f32.mrb[25].mxu1  ;;  %v1881_v30 = vmul.f32 %v4546_v57, %v1877_v23 }
 0xecd   :  { %v2039_v25 = vpop.f32.mrb[26].mxu1 }
 0xece   :  { %v2043_v26 = vmul.f32 %v2039_v25, %v4568_v11  ;;  %v3809_v27 = vpop.f32.mrb[27].mxu1 }
 0xed0   :  { %v2044_v33 = vadd.f32 %v2043_v26, %v1881_v30 }
 0xed1   :  { %v2210_v34 = vpop.f32.mrb[28].mxu1 }
 0xed2   :  { %v2214_v35 = vmul.f32 %v4553_v58, %v2210_v34  ;;  %v3819_v29 = vpop.f32.mrb[29].mxu1 }
 0xed4   :  { %v2215_v62 = vadd.f32 %v2214_v35, %v2044_v33 }
 0xed5   :  { %v2372_v36 = vpop.f32.mrb[30].mxu1 }
 0xed6   :  { %v2376_v37 = vmul.f32 %v2372_v36, %v4573_v13  ;;  %v3829_v38 = vpop.f32.mrb[31].mxu1 }
 0xed7   :  { %v3311_v38 = vld [vmem:[%s4863_s4] sm:$0xff] }
 0xed8   :  { %v2377_v40 = vadd.f32 %v2376_v37, %v2215_v62 }
 0xed9   :  { %v2537_v41 = vpop.f32.mrb[32].mxu1 }
 0xeda   :  { %v3839_v43 = vpop.f32.mrb[33].mxu1  ;;  %3886 = vmatprep.mubr.msk.f32.mxu1 %vm42_vm0, %v2377_v40  ;;  %v2541_v45 = vmul.f32 %v4546_v57, %v2537_v41  ;;  %v3312_v40 = vld [vmem:[%s4863_s4 + $0x8] sm:$0xff] }
 0xedb   :  { %v4023_v41 = vpack.c.bf16 %v3312_v40, %v3311_v38  ;;  %v3313_v43 = vld [vmem:[%s4863_s4 + $0x10] sm:$0xff] }
 0xedd   :  { %v2699_v44 = vpop.f32.mrb[34].mxu1  ;;  %4024 = vmatprep.subr.bf16.mxu0 %v4023_v41 }
 0xede   :  { %v2703_v46 = vmul.f32 %v2699_v44, %v4568_v11  ;;  %v3849_v47 = vpop.f32.mrb[35].mxu1  ;;  %4026 = vmatpush3.bf16.msra.mxu0 %v4023_v41  ;;  %v3314_v44 = vld [vmem:[%s4863_s4 + $0x18] sm:$0xff] }
 0xedf   :  { %v3316_v47 = vld [vmem:[%s4863_s4 + $0x28] sm:$0xff] }
 0xee0   :  { %v2704_v48 = vadd.f32 %v2703_v46, %v2541_v45  ;;  %v4027_v45 = vpack.c.bf16 %v3314_v44, %v3313_v43  ;;  %v3315_v46 = vld [vmem:[%s4863_s4 + $0x20] sm:$0xff] }
 0xee1   :  { %v2861_v49 = vpop.f32.mrb[36].mxu1 }
 0xee2   :  { %v2865_v50 = vmul.f32 %v4553_v58, %v2861_v49  ;;  %v3859_v51 = vpop.f32.mrb[37].mxu1  ;;  %4028 = vmatprep.subr.bf16.mxu0 %v4027_v45  ;;  %v3317_v49 = vld [vmem:[%s4863_s4 + $0x30] sm:$0xff] }
 0xee3   :  { %4030 = vmatpush3.bf16.msra.mxu0 %v4027_v45 }
 0xee4   :  { %v2866_v52 = vadd.f32 %v2865_v50, %v2704_v48  ;;  %v4031_v48 = vpack.c.bf16 %v3316_v47, %v3315_v46  ;;  %v3318_v50 = vld [vmem:[%s4863_s4 + $0x38] sm:$0xff]  ;;  %v4177_v46 = vmov -1.0  }
 0xee5   :  { %v3023_v53 = vpop.f32.mrb[38].mxu1  ;;  %v4035_v51 = vpack.c.bf16 %v3318_v50, %v3317_v49 }
 0xee6   :  { %v3027_v54 = vmul.f32 %v3023_v53, %v4573_v13  ;;  %v3869_v55 = vpop.f32.mrb[39].mxu1  ;;  %4032 = vmatprep.subr.bf16.mxu0 %v4031_v48  ;;  %v3320_v53 = vld [vmem:[%s4863_s4 + $0x48] sm:$0xff] }
 0xee7   :  { %4034 = vmatpush3.bf16.msra.mxu0 %v4031_v48  ;;  %v3321_v55 = vld [vmem:[%s4863_s4 + $0x50] sm:$0xff] }
 0xee8   :  { %v3028_v56 = vadd.f32 %v3027_v54, %v2866_v52  ;;  %4036 = vmatprep.subr.bf16.mxu0 %v4035_v51  ;;  %v3319_v52 = vld [vmem:[%s4863_s4 + $0x40] sm:$0xff] }
 0xee9   :  { %v4039_v54 = vpack.c.bf16 %v3320_v53, %v3319_v52 }
 0xeea   :  { %3887 = vmatmul.mubr.msk.f32.vlgmr.msra.gmra.mrb[40].mxu1 %vm42_vm0, %v3028_v56  ;;  %v3322_v56 = vld [vmem:[%s4863_s4 + $0x58] sm:$0xff] }
 0xeeb   :  { %4010 = vmatpush3.bf16.msra.mxu1 %v4007_v20  ;;  %4038 = vmatpush3.bf16.msra.mxu0 %v4035_v51 }
 0xeec   :  { %4012 = vmatprep.subr.bf16.mxu1 %v4011_v14  ;;  %4040 = vmatprep.subr.bf16.mxu0 %v4039_v54 }
 0xeef   :  { %4014 = vmatpush3.bf16.msra.mxu1 %v4011_v14  ;;  %4042 = vmatpush3.bf16.msra.mxu0 %v4039_v54 }
 0xef0   :  { %4016 = vmatprep.subr.bf16.mxu1 %v4015_v16 }
 0xef3   :  { %4018 = vmatpush3.bf16.msra.mxu1 %v4015_v16 }
 0xef4   :  { %4020 = vmatprep.subr.bf16.mxu1 %v4019_v18 }
 0xef7   :  { %4022 = vmatpush3.bf16.msra.mxu1 %v4019_v18 }
 0xfbd   :  { %v3888_v60 = vpop.f32.mrb[40].mxu1 }
 0xfbe   :  { %v3113_v61 = vpop.f32.mrb[41].mxu1  ;;  %v3119_v57 = vadd.f32 %v3888_v60, %v3039_v59  ;;  %v3323_v60 = vld [vmem:[%s4863_s4 + $0x60] sm:$0xff] }
 0xfbf   :  { %v3114_v63 = vadd.f32 %v3113_v61, %v3039_v59  ;;  %v4043_v59 = vpack.c.bf16 %v3322_v56, %v3321_v55  ;;  %v3324_v61 = vld [vmem:[%s4863_s4 + $0x68] sm:$0xff] }
 0xfc0   :  { %v3123_v58 = vadd.f32 %v3119_v57, %v4562_v10  ;;  %v3572_v10 = vld [vmem:[%s4864_s5 + $0x7] ss:$0 sm:$0xff]  ;;  %v4047_v57 = vpack.c.bf16 %v3324_v61, %v3323_v60  ;;  %v3576_v60 = vld [vmem:[%s4864_s5 + $0x5] ss:$0 sm:$0xff] }
 0xfc1   :  { %v3122_v11 = vadd.f32 %v3114_v63, %v4557_v9  ;;  %4044 = vmatprep.subr.bf16.mxu0 %v4043_v59  ;;  %v3325_v63 = vld [vmem:[%s4863_s4 + $0x70] sm:$0xff] }
 0xfc2   :  { %v3128_v1 = vsel %vm42_vm0, %v3123_v58, 0.0  ;;  %4046 = vmatpush3.bf16.msra.mxu0 %v4043_v59 }
 0xfc3   :  { %v3125_v0 = vsel %vm42_vm0, %v3122_v11, 0.0  ;;  %4048 = vmatprep.subr.bf16.mxu0 %v4047_v57 }
 0xfc4   :  { %3126 = vadd.xlane.f32.xlu1 %v3125_v0 }
 0xfc6   :  { %4050 = vmatpush3.bf16.msra.mxu0 %v4047_v57 }
 0xfc8   :  { %3129 = vadd.xlane.f32.xlu1 %v3128_v1 }
0x1051   :  { %v3127_v13 = vpop.xlane.xlu1 %3126 }
0x1052   :  { %v3131_v2 = vmul.f32 0.015625, %v3127_v13 }
0x1054   :  { %v3133_v32 = vsub.f32 %v3122_v11, %v3131_v2  ;;  %v3326_v11 = vld [vmem:[%s4863_s4 + $0x78] sm:$0xff] }
0x1055   :  { %v3130_v3 = vpop.xlane.xlu1 %3129  ;;  %v4051_v0 = vpack.c.bf16 %v3326_v11, %v3325_v63 }
0x1056   :  { %v3132_v4 = vmul.f32 0.015625, %v3130_v3  ;;  %v3135_v6 = vmul.f32 %v3133_v32, %v3133_v32 }
0x1057   :  { %4052 = vmatprep.subr.bf16.mxu0 %v4051_v0 }
0x1058   :  { %v3134_v5 = vsub.f32 %v3123_v58, %v3132_v4  ;;  %v3137_v9 = vsel %vm42_vm0, %v3135_v6, 0.0  ;;  %4054 = vmatpush3.bf16.msra.mxu0 %v4051_v0  ;;  %v3573_v58 = vld [vmem:[%s4864_s5 + $0x4] ss:$0 sm:$0xff] }
0x105a   :  { %v3136_v42 = vmul.f32 %v3134_v5, %v3134_v5 }
0x105c   :  { %v3140_v28 = vsel %vm42_vm0, %v3136_v42, 0.0 }
0x105d   :  { %3141 = vadd.xlane.f32.xlu1 %v3140_v28 }
0x1061   :  { %3138 = vadd.xlane.f32.xlu1 %v3137_v9 }
0x1072   :  { %3158 = vrot.lane.b32.xlu1 %v3572_v10, %s4175_s27 }
0x10ea   :  { %v3142_v19 = vpop.xlane.xlu1 %3141 }
0x10eb   :  { %v3144_v21 = vmul.f32 0.015625, %v3142_v19 }
0x10ed   :  { %v3146_v23 = vadd.f32 1e-05, %v3144_v21 }
0x10ee   :  { %v3139_v24 = vpop.xlane.xlu1 %3138 }
0x10ef   :  { %4130 = vrsqrt.f32 %v3146_v23  ;;  %v3143_v25 = vmul.f32 0.015625, %v3139_v24 }
0x10f1   :  { %v3145_v30 = vadd.f32 1e-05, %v3143_v25 }
0x10f2   :  { %v3159_v62 = vpop.permute.xlu1 %3158 }
0x10f3   :  { %4132 = vrsqrt.f32 %v3145_v30 }
0x10f9   :  { %v4131_v26 = vpop.eup %4130 }
0x10fa   :  { %v3150_v27 = vmul.f32 %v4131_v26, %v3134_v5 }
0x10fc   :  { %v3156_v35 = vmul.f32 %v3572_v10, %v3150_v27 }
0x10fd   :  { %v4133_v33 = vpop.eup %4132 }
0x10fe   :  { %v3149_v34 = vmul.f32 %v4133_v33, %v3133_v32  ;;  %v4765_v37 = vadd.f32 %v3159_v62, %v3156_v35 }
0x1100   :  { %v3155_v29 = vmul.f32 %v3572_v10, %v3149_v34 }
0x1102   :  { %v4763_v36 = vadd.f32 %v3159_v62, %v3155_v29 }
0x1104   :  { %3905 = vmatprep.mubr.msk.f32.mxu1 %vm42_vm0, %v4763_v36 }
0x1105   :  { %3906 = vmatmul.mubr.msk.f32.vlgmr.msra.gmra.mrb[42].mxu1 %vm42_vm0, %v4765_v37 }
0x11d8   :  { %v3907_v1 = vpop.f32.mrb[42].mxu1 }
0x11d9   :  { %v3254_v13 = vadd.f32 %v3907_v1, %v3573_v58  ;;  %v3248_v2 = vpop.f32.mrb[43].mxu1 }
0x11da   :  { %v3249_v3 = vadd.f32 %v3573_v58, %v3248_v2 }
0x11db   :  { %v3260_v4 = vmul.f32 0.70710677, %v3254_v13  ;;  %v3258_v55 = vmul.f32 0.5, %v3254_v13 }
0x11dc   :  { %v3259_v32 = vmul.f32 0.70710677, %v3249_v3  ;;  %v3257_v53 = vmul.f32 0.5, %v3249_v3 }
0x11dd   :  { %v3266_v5 = vand.u32 2147483647, %v3260_v4  ;;  %vm3262_vm3 = vcmp.ge.f32.partialorder %v3260_v4, 0.0 }
0x11de   :  { %v3265_v42 = vand.u32 2147483647, %v3259_v32  ;;  %vm3261_vm4 = vcmp.ge.f32.partialorder %v3259_v32, 0.0  ;;  %v3264_v47 = vsel %vm3262_vm3, 1.0, %v4177_v46 }
0x11df   :  { %v3268_v28 = vmul.f32 0.3275911, %v3266_v5  ;;  %v3294_v22 = vsub.f32 0.0, %v3266_v5  ;;  %v3263_v50 = vsel %vm3261_vm4, 1.0, %v4177_v46 }
0x11e0   :  { %v3267_v6 = vmul.f32 0.3275911, %v3265_v42  ;;  %v3293_v8 = vsub.f32 0.0, %v3265_v42 }
0x11e1   :  { %v3270_v9 = vadd.f32 1.0, %v3268_v28  ;;  %v3296_v20 = vmul.f32 %v3294_v22, %v3266_v5  ;;  %v3577_v22 = vld [vmem:[%s4864_s5 + $0x8] ss:$0 sm:$0xff] }
0x11e2   :  { %v3269_v10 = vadd.f32 1.0, %v3267_v6  ;;  %v3295_v7 = vmul.f32 %v3293_v8, %v3265_v42 }
0x11e3   :  { %4134 = vrcp.f32 %v3270_v9  ;;  %v3299_v39 = vmul.f32 1.442695, %v3296_v20 }
0x11e4   :  { %4136 = vrcp.f32 %v3269_v10  ;;  %v3297_v19 = vmul.f32 1.442695, %v3295_v7 }
0x11e5   :  { %4138 = vpow2.f32 %v3299_v39 }
0x11e6   :  { %4140 = vpow2.f32 %v3297_v19 }
0x11ed   :  { %v4135_v12 = vpop.eup %4134 }
0x11ee   :  { %v4137_v31 = vpop.eup %4136  ;;  %v3276_v14 = vmul.f32 1.0614054, %v4135_v12 }
0x11ef   :  { %v3275_v15 = vmul.f32 1.0614054, %v4137_v31  ;;  %v4139_v38 = vpop.eup %4138 }
0x11f0   :  { %v3278_v16 = vadd.f32 -1.4531521, %v3276_v14  ;;  %v4141_v41 = vpop.eup %4140 }
0x11f1   :  { %v3277_v17 = vadd.f32 -1.4531521, %v3275_v15 }
0x11f2   :  { %v3280_v18 = vmul.f32 %v4135_v12, %v3278_v16 }
0x11f3   :  { %v3279_v21 = vmul.f32 %v4137_v31, %v3277_v17 }
0x11f4   :  { %v3282_v23 = vadd.f32 1.4214138, %v3280_v18 }
0x11f5   :  { %v3281_v24 = vadd.f32 1.4214138, %v3279_v21 }
0x11f6   :  { %v3284_v25 = vmul.f32 %v4135_v12, %v3282_v23 }
0x11f7   :  { %v3283_v30 = vmul.f32 %v4137_v31, %v3281_v24 }
0x11f8   :  { %v3286_v26 = vadd.f32 -0.28449672, %v3284_v25 }
0x11f9   :  { %v3285_v27 = vadd.f32 -0.28449672, %v3283_v30 }
0x11fa   :  { %v3288_v33 = vmul.f32 %v4135_v12, %v3286_v26 }
0x11fb   :  { %v3287_v34 = vmul.f32 %v4137_v31, %v3285_v27 }
0x11fc   :  { %v3290_v35 = vadd.f32 0.2548296, %v3288_v33 }
0x11fd   :  { %v3289_v29 = vadd.f32 0.2548296, %v3287_v34 }
0x11fe   :  { %v3292_v62 = vmul.f32 %v4135_v12, %v3290_v35 }
0x11ff   :  { %v3291_v40 = vmul.f32 %v4137_v31, %v3289_v29 }
0x1200   :  { %v3302_v43 = vmul.f32 %v4139_v38, %v3292_v62 }
0x1201   :  { %v3301_v44 = vmul.f32 %v4141_v41, %v3291_v40 }
0x1202   :  { %v3304_v45 = vsub.f32 1.0, %v3302_v43 }
0x1203   :  { %v3303_v48 = vsub.f32 1.0, %v3301_v44 }
0x1204   :  { %v3306_v49 = vmul.f32 %v3304_v45, %v3264_v47 }
0x1205   :  { %v3305_v51 = vmul.f32 %v3303_v48, %v3263_v50 }
0x1206   :  { %v3308_v52 = vadd.f32 1.0, %v3306_v49 }
0x1207   :  { %v3307_v54 = vadd.f32 1.0, %v3305_v51 }
0x1208   :  { %v3310_v59 = vmul.f32 %v3308_v52, %v3258_v55 }
0x1209   :  { %v3309_v56 = vmul.f32 %v3307_v54, %v3257_v53 }
0x120b   :  { %3940 = vmatprep.mubr.f32.mxu0 %v3309_v56 }
0x120c   :  { %3941 = vmatmul.mubr.f32.vlgmr.msra.gmra.mrb[34].mxu0 %v3310_v59 }
0x12df   :  { %v3942_v61 = vpop.f32.mrb[34].mxu0 }
0x12e0   :  { %v3404_v57 = vadd.f32 %v3942_v61, %v3576_v60  ;;  %v3398_v63 = vpop.f32.mrb[35].mxu0 }
0x12e1   :  { %v3399_v11 = vadd.f32 %v3576_v60, %v3398_v63 }
0x12e2   :  { %v3408_v0 = vadd.f32 %v3404_v57, %v4765_v37 }
0x12e3   :  { %v3407_v58 = vadd.f32 %v3399_v11, %v4763_v36 }
0x12e4   :  { %v3413_v1 = vsel %vm42_vm0, %v3408_v0, 0.0 }
0x12e5   :  { %3414 = vadd.xlane.f32.xlu1 %v3413_v1  ;;  %v3410_v13 = vsel %vm42_vm0, %v3407_v58, 0.0 }
0x12e6   :  { %3411 = vadd.xlane.f32.xlu0 %v3410_v13 }
0x1372   :  { %v3415_v2 = vpop.xlane.xlu1 %3414 }
0x1373   :  { %v3417_v3 = vmul.f32 0.015625, %v3415_v2  ;;  %v3412_v4 = vpop.xlane.xlu0 %3411 }
0x1374   :  { %v3416_v32 = vmul.f32 0.015625, %v3412_v4 }
0x1375   :  { %v3419_v5 = vsub.f32 %v3408_v0, %v3417_v3 }
0x1376   :  { %v3418_v42 = vsub.f32 %v3407_v58, %v3416_v32 }
0x1377   :  { %v3421_v9 = vmul.f32 %v3419_v5, %v3419_v5 }
0x1378   :  { %v3420_v28 = vmul.f32 %v3418_v42, %v3418_v42 }
0x1379   :  { %v3425_v10 = vsel %vm42_vm0, %v3421_v9, 0.0 }
0x137a   :  { %v3422_v6 = vsel %vm42_vm0, %v3420_v28, 0.0 }
0x137b   :  { %3423 = vadd.xlane.f32.xlu0 %v3422_v6 }
0x137f   :  { %3426 = vadd.xlane.f32.xlu0 %v3425_v10 }
0x1395   :  { %3443 = vrot.lane.b32.xlu0 %v3577_v22, %s4175_s27 }
0x1408   :  { %v3424_v8 = vpop.xlane.xlu0 %3423 }
0x1409   :  { %v3428_v12 = vmul.f32 0.015625, %v3424_v8 }
0x140b   :  { %v3430_v20 = vadd.f32 1e-05, %v3428_v12 }
0x140c   :  { %v3427_v31 = vpop.xlane.xlu0 %3426 }
0x140d   :  { %4142 = vrsqrt.f32 %v3430_v20  ;;  %v3429_v14 = vmul.f32 0.015625, %v3427_v31 }
0x140f   :  { %v3431_v7 = vadd.f32 1e-05, %v3429_v14 }
0x1410   :  { %v3444_v39 = vpop.permute.xlu0 %3443 }
0x1411   :  { %4144 = vrsqrt.f32 %v3431_v7 }
0x1417   :  { %v4143_v15 = vpop.eup %4142 }
0x1418   :  { %v3434_v16 = vmul.f32 %v4143_v15, %v3418_v42 }
0x141a   :  { %v3440_v17 = vmul.f32 %v3577_v22, %v3434_v16 }
0x141b   :  { %v4145_v18 = vpop.eup %4144 }
0x141c   :  { %v3435_v19 = vmul.f32 %v4145_v18, %v3419_v5  ;;  %v3446_v21 = vadd.f32 %v3444_v39, %v3440_v17 }
0x141e   :  { %v3441_v23 = vmul.f32 %v3577_v22, %v3435_v19  ;;  %v3448_v24 = vadd.f32 %v3446_v21, %v4763_v36 }
0x1420   :  { %v3447_v25 = vadd.f32 %v3444_v39, %v3441_v23  ;;  %v3451_v30 = vsel %vm42_vm0, %v3448_v24, 0.0 }
0x1421   :  { %3452 = vadd.xlane.f32.xlu1 %v3451_v30 }
0x1422   :  { %v3449_v26 = vadd.f32 %v3447_v25, %v4765_v37  ;;  %v3578_v37 = vld [vmem:[%s4864_s5 + $0x9] ss:$0 sm:$0xff]  ;;  %s4150_s5 = scalar_lea.vmem %s3497_s21, 256 }
0x1423   :  { %p4151_p0 = scmp.ne.s32.totalorder %s3497_s21, %s4150_s5  ;;  %p4156_p2 = scmp.lt.s32.totalorder %s4150_s5, %s4150_s5 }
0x1424   :  { %v3454_v27 = vsel %vm42_vm0, %v3449_v26, 0.0 }
0x1425   :  { %3455 = vadd.xlane.f32.xlu1 %v3454_v27  ;;  %p4157_p3 = por %p4156_p2, %p4155_p1 }
0x1427   :  { %p4158_p4 = pnand %p4157_p3, %p4151_p0 }
0x14ae   :  { %v3453_v33 = vpop.xlane.xlu1 %3452 }
0x14af   :  { %v3457_v34 = vmul.f32 0.015625, %v3453_v33 }
0x14b1   :  { %v3459_v35 = vsub.f32 %v3448_v24, %v3457_v34 }
0x14b2   :  { %v3456_v29 = vpop.xlane.xlu1 %3455 }
0x14b3   :  { %v3458_v62 = vmul.f32 0.015625, %v3456_v29  ;;  %v3461_v38 = vmul.f32 %v3459_v35, %v3459_v35 }
0x14b5   :  { %v3460_v40 = vsub.f32 %v3449_v26, %v3458_v62  ;;  %v3463_v41 = vsel %vm42_vm0, %v3461_v38, 0.0 }
0x14b6   :  { %3464 = vadd.xlane.f32.xlu1 %v3463_v41 }
0x14b7   :  { %v3462_v36 = vmul.f32 %v3460_v40, %v3460_v40 }
0x14b9   :  { %v3466_v43 = vsel %vm42_vm0, %v3462_v36, 0.0 }
0x14ba   :  { %3467 = vadd.xlane.f32.xlu0 %v3466_v43 }
0x14c7   :  { %3484 = vrot.lane.b32.xlu1 %v3578_v37, %s4175_s27 }
0x1543   :  { %v3465_v44 = vpop.xlane.xlu1 %3464 }
0x1544   :  { %v3469_v45 = vmul.f32 0.015625, %v3465_v44 }
0x1546   :  { %v3471_v46 = vadd.f32 1e-05, %v3469_v45 }
0x1547   :  { %v3468_v47 = vpop.xlane.xlu0 %3467  ;;  %v3485_v52 = vpop.permute.xlu1 %3484 }
0x1548   :  { %4146 = vrsqrt.f32 %v3471_v46  ;;  %v3470_v48 = vmul.f32 0.015625, %v3468_v47 }
0x154a   :  { %v3472_v49 = vadd.f32 1e-05, %v3470_v48 }
0x154c   :  { %4148 = vrsqrt.f32 %v3472_v49 }
0x1552   :  { %v4147_v50 = vpop.eup %4146 }
0x1553   :  { %v3475_v51 = vmul.f32 %v4147_v50, %v3459_v35 }
0x1555   :  { %v3481_v53 = vmul.f32 %v3578_v37, %v3475_v51 }
0x1556   :  { %v4149_v54 = vpop.eup %4148 }
0x1557   :  { %v3476_v55 = vmul.f32 %v4149_v54, %v3460_v40  ;;  %v3487_v56 = vadd.f32 %v3485_v52, %v3481_v53 }
0x1559   :  { %v3482_v59 = vmul.f32 %v3578_v37, %v3476_v55  ;;  %3489 = vst.msk [vmem:[#allocation2] sm:$0xff] %vm42_vm0, %v3487_v56 }
0x155b   :  { %v3488_v60 = vadd.f32 %v3485_v52, %v3482_v59 }
0x155d   :  { %3490 = vst.msk [vmem:[#allocation2 + $0x8] sm:$0xff] %vm42_vm0, %v3488_v60 }
0x155e   :  { %4161 = shalt.err (!%p4158_p4)
}
0x155f   :  { %s4162_s1 = scalar_lea.hbm %s4865_s6, 256 }
0x1560   :  { %p4163_p5 = scmp.ne.s32.totalorder %s4865_s6, %s4162_s1  ;;  %p4166_p6 = scmp.lt.u32.totalorder %s4162_s1, %s4865_s6 }
0x1562   :  { %p4168_p7 = pnand %p4166_p6, %p4163_p5 }
0x1564   :  { %4171 = shalt.err (!%p4168_p7)
}
0x1565   :  { %s4179_s28 = smov 128   ;;  %s4180_s29 = smov 8  }
0x1566   :  { %3502 = dma.vmem_to_hbm [thread:$0]  %s3497_s21, 256, %s4865_s6, [#allocation3], %s4179_s28, %s4179_s28, %s4180_s29  }
0x1567   :  { %4172 = dma.done.wait [#allocation3], 256  }
0x1568   :  { %4173 = vsyncadd [#allocation3], 4294967040 }
0x1569   :  { %3506 = vsyncpa [#allocation3], 1 }

</bundles_post_ra>
